<compile_context>
chip_gen: v6e
topology: v6e:2x2x1
jax: 0.10.0
libtpu: 0.0.40
codegen_flags: <defaults>
</compile_context>

<pallas_src>
import functools

import jax
import jax.numpy as jnp
import numpy as np
from jax.experimental import pallas as pl
from jax.experimental.pallas import tpu as pltpu

# --- scaled-down dims consistent with the module -----------------------------
EMBED_DIM = 32                  # original: 300
ONEHOT_DIM = EMBED_DIM          # module requires onehot_dimension == embed_dim
HIDDEN_DIM = 128                # original: 800
NUM_OUT = 1000                  # decoder output size, hardcoded in the module
NUM_OUT_PAD = 1024              # padded to a multiple of 128 (lane-dense stores)
IN_FUSED = 3 * EMBED_DIM        # 96  (embed + embed + onehot)
IN_PAD = 128                    # fused input padded to a full lane group
VOCAB = 40
NUM_MOVIES = 5
SEQ_LEN = 6
BATCH = 8
NUM_LAYERS = 1                  # => dropout = 0, unidirectional


# ----------------------------- Pallas kernel ---------------------------------
def fused_gru_decoder_kernel(x_ref, wih_ref, whh_ref, bgi_ref, bhn_ref,
                             wdec_ref, bdec_ref, states_ref, logits_ref,
                             gi_ref, *, seq_len, batch):
    """Whole forward pass (GRU recurrence + decoder) in one kernel invocation.

    x_ref:      (S*B, IN_PAD)     fused, zero-padded input, time-major rows
    wih_ref:    (IN_PAD, 3H)      input->gate weights, transposed, zero rows
    whh_ref:    (H, 3H)           hidden->gate weights, transposed
    bgi_ref:    (1, 3H)           b_ih with the r/z slices of b_hh folded in
    bhn_ref:    (1, H)            n-slice of b_hh (added inside tanh branch)
    wdec_ref:   (H, NUM_OUT_PAD)  decoder weights, transposed, zero-padded cols
    bdec_ref:   (1, NUM_OUT_PAD)  decoder bias, zero-padded
    states_ref: (S*B, H)          per-step hidden states (output)
    logits_ref: (S*B, NUM_OUT_PAD) decoder logits (output)
    gi_ref:     (S*B, 3H)         VMEM scratch for the hoisted input projection
    Gate order is PyTorch's [r, z, n]; h' = (1-z)*n + z*h.
    """
    H = whh_ref.shape[0]
    B = batch

    # --- hoisted input projection: one big matmul instead of S tiny ones ----
    gi_ref[...] = (jnp.dot(x_ref[...], wih_ref[...],
                           preferred_element_type=jnp.float32)
                   + bgi_ref[...])

    bhn = bhn_ref[...]                                    # (1, H), 1 vreg

    def step(t, h):
        row = t * B
        gi = gi_ref[pl.ds(row, B), :]                     # (B, 3H)
        # Operand streams from the VMEM ref at the dot (no hoisted weight value).
        gh = jnp.dot(h, whh_ref[...], preferred_element_type=jnp.float32)
        r = jax.nn.sigmoid(gi[:, :H] + gh[:, :H])
        z = jax.nn.sigmoid(gi[:, H:2 * H] + gh[:, H:2 * H])
        n = jnp.tanh(gi[:, 2 * H:] + r * (gh[:, 2 * H:] + bhn))
        h_new = (1.0 - z) * n + z * h
        states_ref[pl.ds(row, B), :] = h_new              # single store per step
        return h_new

    h0 = jnp.zeros((B, H), jnp.float32)
    jax.lax.fori_loop(0, seq_len, step, h0, unroll=True)

    # --- fused decoder epilogue: (S*B, H) @ (H, NUM_OUT_PAD) + b -------------
    logits_ref[...] = (jnp.dot(states_ref[...], wdec_ref[...],
                               preferred_element_type=jnp.float32)
                       + bdec_ref[...])


# ----------------------------- pallas_call wrapper ----------------------------
def fused_forward_pallas(x_flat, wih_pad, whh_t, b_gi, b_hn, wdec_pad, bdec_pad):
    SB = x_flat.shape[0]
    H = HIDDEN_DIM
    vmem = pl.BlockSpec(memory_space=pltpu.MemorySpace.VMEM)
    kernel = functools.partial(fused_gru_decoder_kernel,
                               seq_len=SEQ_LEN, batch=BATCH)
    return pl.pallas_call(
        kernel,
        out_shape=(jax.ShapeDtypeStruct((SB, H), jnp.float32),
                   jax.ShapeDtypeStruct((SB, NUM_OUT_PAD), jnp.float32)),
        in_specs=[vmem] * 7,
        out_specs=(vmem, vmem),
        scratch_shapes=[pltpu.VMEM((SB, 3 * H), jnp.float32)],
    )(x_flat, wih_pad, whh_t, b_gi, b_hn, wdec_pad, bdec_pad)


# ------------------------------- glue / model --------------------------------
def _prep_pallas_params(params):
    """Zero-pad / precombine parameters for the lane-dense kernel layouts."""
    H = HIDDEN_DIM
    wih_pad = jnp.pad(params["wih_t"], ((0, IN_PAD - IN_FUSED), (0, 0)))
    # Fold the r/z slices of b_hh into b_ih; keep the n-slice separate because
    # PyTorch GRU multiplies it by r inside the tanh branch.
    b_gi = params["b_ih"] + params["b_hh"].at[:, 2 * H:].set(0.0)
    b_hn = params["b_hh"][:, 2 * H:]
    wdec_pad = jnp.pad(params["wdec_t"], ((0, 0), (0, NUM_OUT_PAD - NUM_OUT)))
    bdec_pad = jnp.pad(params["b_dec"], ((0, 0), (0, NUM_OUT_PAD - NUM_OUT)))
    return wih_pad, params["whh_t"], b_gi, b_hn, wdec_pad, bdec_pad


def tatlstm_forward(inputs, movie, topics, params):
    """Mirrors TATLSTM.forward (hidden=None path). Returns (outputs, hidden)."""
    weight = params["embedding"]                       # (VOCAB, E)
    embeddings = weight[inputs]                        # (B, S, E)
    topics_embed = weight[topics]                      # (B, 1, E)
    movie_vec = params["movie_to_onehot"][movie]       # (B, ONEHOT)
    movie_vec = movie_vec.reshape(-1, 1, ONEHOT_DIM).astype(jnp.float32)
    topics_embed = jnp.concatenate((movie_vec, topics_embed), axis=2)   # (B,1,2E)
    topics_embed = jnp.broadcast_to(
        topics_embed,
        (embeddings.shape[0], embeddings.shape[1], topics_embed.shape[2]))
    embeddings = jnp.concatenate((embeddings, topics_embed), axis=2)    # (B,S,3E)
    x_sbe = jnp.transpose(embeddings, (1, 0, 2))                        # (S,B,3E)
    x_pad = jnp.pad(x_sbe, ((0, 0), (0, 0), (0, IN_PAD - IN_FUSED)))    # (S,B,128)
    x_flat = x_pad.reshape(-1, IN_PAD)                                  # (S*B,128)

    wih_pad, whh_t, b_gi, b_hn, wdec_pad, bdec_pad = _prep_pallas_params(params)

    states_flat, logits_pad = fused_forward_pallas(
        x_flat, wih_pad, whh_t, b_gi, b_hn, wdec_pad, bdec_pad)
    outputs = logits_pad[:, :NUM_OUT]                  # (S*B, 1000)
    hidden = states_flat.reshape(SEQ_LEN, BATCH, HIDDEN_DIM)[-1:]  # (1,B,H)
    return outputs, hidden


def tatlstm_reference(inputs, movie, topics, params):
    """Pure-JAX reference for correctness checking (raw, un-padded params)."""
    weight = params["embedding"]
    embeddings = weight[inputs]
    topics_embed = weight[topics]
    movie_vec = params["movie_to_onehot"][movie].reshape(-1, 1, ONEHOT_DIM)
    topics_embed = jnp.concatenate((movie_vec.astype(jnp.float32), topics_embed), 2)
    topics_embed = jnp.broadcast_to(
        topics_embed,
        (embeddings.shape[0], embeddings.shape[1], topics_embed.shape[2]))
    x = jnp.transpose(jnp.concatenate((embeddings, topics_embed), 2), (1, 0, 2))

    H = HIDDEN_DIM

    def step(h, x_t):
        gi = x_t @ params["wih_t"] + params["b_ih"]
        gh = h @ params["whh_t"] + params["b_hh"]
        r = jax.nn.sigmoid(gi[:, :H] + gh[:, :H])
        z = jax.nn.sigmoid(gi[:, H:2 * H] + gh[:, H:2 * H])
        n = jnp.tanh(gi[:, 2 * H:] + r * gh[:, 2 * H:])
        h_new = (1.0 - z) * n + z * h
        return h_new, h_new

    h0 = jnp.zeros((x.shape[1], H), jnp.float32)
    hT, states = jax.lax.scan(step, h0, x)
    outputs = states.reshape(-1, H) @ params["wdec_t"] + params["b_dec"]
    return outputs, hT[None]


def make_params(key):
    ks = jax.random.split(key, 8)
    H, E3 = HIDDEN_DIM, 3 * EMBED_DIM
    scale = 1.0 / np.sqrt(HIDDEN_DIM)
    params = {
        "embedding": jax.random.normal(ks[0], (VOCAB, EMBED_DIM), jnp.float32) * 0.1,
        "movie_to_onehot": jnp.eye(NUM_MOVIES, ONEHOT_DIM, dtype=jnp.float32),
        # GRU weights, stored transposed: (in, 3H) / (H, 3H); gate order [r, z, n]
        "wih_t": jax.random.uniform(ks[1], (E3, 3 * H), jnp.float32, -scale, scale),
        "whh_t": jax.random.uniform(ks[2], (H, 3 * H), jnp.float32, -scale, scale),
        "b_ih": jax.random.uniform(ks[3], (1, 3 * H), jnp.float32, -scale, scale),
        "b_hh": jax.random.uniform(ks[4], (1, 3 * H), jnp.float32, -scale, scale),
        # Decoder Linear(H, 1000), stored transposed
        "wdec_t": jax.random.uniform(ks[5], (H, NUM_OUT), jnp.float32, -scale, scale),
        "b_dec": jax.random.uniform(ks[6], (1, NUM_OUT), jnp.float32, -scale, scale),
    }
    return params


if __name__ == "__main__":
    key = jax.random.PRNGKey(0)
    kp, ki, km, kt = jax.random.split(key, 4)

    params = make_params(kp)
    inputs = jax.random.randint(ki, (BATCH, SEQ_LEN), 0, VOCAB, dtype=jnp.int32)
    movie = jax.random.randint(km, (BATCH,), 0, NUM_MOVIES, dtype=jnp.int32)
    topics = jax.random.randint(kt, (BATCH, 1), 0, VOCAB, dtype=jnp.int32)

    fwd = jax.jit(tatlstm_forward)
    outputs, hidden = fwd(inputs, movie, topics, params)
    jax.block_until_ready((outputs, hidden))

    # Sanity check against a pure-JAX reference of the same math.
    ref_out, ref_hid = tatlstm_reference(inputs, movie, topics, params)
    np.testing.assert_allclose(np.asarray(outputs), np.asarray(ref_out),
                               rtol=1e-4, atol=1e-4)
    np.testing.assert_allclose(np.asarray(hidden), np.asarray(ref_hid),
                               rtol=1e-4, atol=1e-4)
    assert outputs.shape == (SEQ_LEN * BATCH, NUM_OUT)
    assert hidden.shape == (NUM_LAYERS, BATCH, HIDDEN_DIM)

    print("KERNEL_OK")
</pallas_src>

<mosaic_0001>
module attributes {stable_mosaic.version = 11 : i64} {
  func.func @fused_gru_decoder_kernel(%arg0: memref<48x128xf32, #tpu.memory_space<vmem>>, %arg1: memref<128x384xf32, #tpu.memory_space<vmem>>, %arg2: memref<128x384xf32, #tpu.memory_space<vmem>>, %arg3: memref<1x384xf32, #tpu.memory_space<vmem>>, %arg4: memref<1x128xf32, #tpu.memory_space<vmem>>, %arg5: memref<128x1024xf32, #tpu.memory_space<vmem>>, %arg6: memref<1x1024xf32, #tpu.memory_space<vmem>>, %arg7: memref<48x128xf32, #tpu.memory_space<vmem>>, %arg8: memref<48x1024xf32, #tpu.memory_space<vmem>>, %arg9: memref<48x384xf32, #tpu.memory_space<vmem>>) attributes {dimension_semantics = [], scalar_prefetch = 0 : i64, scratch_operands = 1 : i64, tpu.core_type = #tpu.core_type<tc>} {
    %c0 = arith.constant 0 : index
    %c0_0 = arith.constant 0 : index
    %0 = vector.load %arg0[%c0, %c0_0] : memref<48x128xf32, #tpu.memory_space<vmem>>, vector<48x128xf32>
    %c0_1 = arith.constant 0 : index
    %c0_2 = arith.constant 0 : index
    %1 = vector.load %arg1[%c0_1, %c0_2] : memref<128x384xf32, #tpu.memory_space<vmem>>, vector<128x384xf32>
    %cst = arith.constant dense<0.000000e+00> : vector<48x384xf32>
    %2 = tpu.matmul %0, %1, %cst {dimension_numbers = #tpu.dot_dimension_numbers<[1], [0], [0], [1], [0, 0, 1, 1], [], []>} : vector<48x128xf32>, vector<128x384xf32>, vector<48x384xf32> -> vector<48x384xf32>
    %c0_3 = arith.constant 0 : index
    %c0_4 = arith.constant 0 : index
    %3 = vector.load %arg3[%c0_3, %c0_4] : memref<1x384xf32, #tpu.memory_space<vmem>>, vector<1x384xf32>
    %4 = vector.broadcast %3 : vector<1x384xf32> to vector<48x384xf32>
    %5 = arith.addf %2, %4 : vector<48x384xf32>
    %c0_5 = arith.constant 0 : index
    %c0_6 = arith.constant 0 : index
    %6 = vector.load %arg9[%c0_5, %c0_6] : memref<48x384xf32, #tpu.memory_space<vmem>>, vector<48x384xf32>
    tpu.vector_store %arg9[%c0_5, %c0_6], %5 {strides = array<i32>} : memref<48x384xf32, #tpu.memory_space<vmem>>, vector<48x384xf32>,
    %c0_7 = arith.constant 0 : index
    %c0_8 = arith.constant 0 : index
    %7 = vector.load %arg4[%c0_7, %c0_8] : memref<1x128xf32, #tpu.memory_space<vmem>>, vector<1x128xf32>
    %cst_9 = arith.constant 0.000000e+00 : f32
    %8 = vector.broadcast %cst_9 : f32 to vector<8x128xf32>
    %c0_i32 = arith.constant 0 : i32
    %c8_i32 = arith.constant 8 : i32
    %9 = arith.muli %c0_i32, %c8_i32 : i32
    %10 = arith.index_cast %9 : i32 to index
    %c0_10 = arith.constant 0 : index
    %11 = vector.load %arg9[%10, %c0_10] : memref<48x384xf32, #tpu.memory_space<vmem>>, vector<8x384xf32>
    %c0_11 = arith.constant 0 : index
    %c0_12 = arith.constant 0 : index
    %12 = vector.load %arg2[%c0_11, %c0_12] : memref<128x384xf32, #tpu.memory_space<vmem>>, vector<128x384xf32>
    %cst_13 = arith.constant dense<0.000000e+00> : vector<8x384xf32>
    %13 = tpu.matmul %8, %12, %cst_13 {dimension_numbers = #tpu.dot_dimension_numbers<[1], [0], [0], [1], [0, 0, 1, 1], [], []>} : vector<8x128xf32>, vector<128x384xf32>, vector<8x384xf32> -> vector<8x384xf32>
    %14 = vector.extract_strided_slice %11 {offsets = [0, 0], sizes = [8, 128], strides = [1, 1]} : vector<8x384xf32> to vector<8x128xf32>
    %15 = vector.extract_strided_slice %13 {offsets = [0, 0], sizes = [8, 128], strides = [1, 1]} : vector<8x384xf32> to vector<8x128xf32>
    %16 = arith.addf %14, %15 : vector<8x128xf32>
    %17 = arith.negf %16 : vector<8x128xf32>
    %18 = math.exp %17 : vector<8x128xf32>
    %cst_14 = arith.constant 1.000000e+00 : f32
    %19 = vector.broadcast %cst_14 : f32 to vector<8x128xf32>
    %20 = arith.addf %19, %18 : vector<8x128xf32>
    %21 = arith.divf %19, %20 : vector<8x128xf32>
    %22 = vector.extract_strided_slice %11 {offsets = [0, 128], sizes = [8, 128], strides = [1, 1]} : vector<8x384xf32> to vector<8x128xf32>
    %23 = vector.extract_strided_slice %13 {offsets = [0, 128], sizes = [8, 128], strides = [1, 1]} : vector<8x384xf32> to vector<8x128xf32>
    %24 = arith.addf %22, %23 : vector<8x128xf32>
    %25 = arith.negf %24 : vector<8x128xf32>
    %26 = math.exp %25 : vector<8x128xf32>
    %cst_15 = arith.constant 1.000000e+00 : f32
    %27 = vector.broadcast %cst_15 : f32 to vector<8x128xf32>
    %28 = arith.addf %27, %26 : vector<8x128xf32>
    %29 = arith.divf %27, %28 : vector<8x128xf32>
    %30 = vector.extract_strided_slice %11 {offsets = [0, 256], sizes = [8, 128], strides = [1, 1]} : vector<8x384xf32> to vector<8x128xf32>
    %31 = vector.extract_strided_slice %13 {offsets = [0, 256], sizes = [8, 128], strides = [1, 1]} : vector<8x384xf32> to vector<8x128xf32>
    %32 = vector.broadcast %7 : vector<1x128xf32> to vector<8x128xf32>
    %33 = arith.addf %31, %32 : vector<8x128xf32>
    %34 = arith.mulf %21, %33 : vector<8x128xf32>
    %35 = arith.addf %30, %34 : vector<8x128xf32>
    %36 = math.tanh %35 : vector<8x128xf32>
    %cst_16 = arith.constant 1.000000e+00 : f32
    %37 = vector.broadcast %cst_16 : f32 to vector<8x128xf32>
    %38 = arith.subf %37, %29 : vector<8x128xf32>
    %39 = arith.mulf %38, %36 : vector<8x128xf32>
    %40 = arith.mulf %29, %8 : vector<8x128xf32>
    %41 = arith.addf %39, %40 : vector<8x128xf32>
    %42 = arith.index_cast %9 : i32 to index
    %c0_17 = arith.constant 0 : index
    %43 = vector.load %arg7[%42, %c0_17] : memref<48x128xf32, #tpu.memory_space<vmem>>, vector<8x128xf32>
    tpu.vector_store %arg7[%42, %c0_17], %41 {strides = array<i32>} : memref<48x128xf32, #tpu.memory_space<vmem>>, vector<8x128xf32>,
    %c1_i32 = arith.constant 1 : i32
    %c8_i32_18 = arith.constant 8 : i32
    %44 = arith.muli %c1_i32, %c8_i32_18 : i32
    %45 = arith.index_cast %44 : i32 to index
    %c0_19 = arith.constant 0 : index
    %46 = vector.load %arg9[%45, %c0_19] : memref<48x384xf32, #tpu.memory_space<vmem>>, vector<8x384xf32>
    %c0_20 = arith.constant 0 : index
    %c0_21 = arith.constant 0 : index
    %47 = vector.load %arg2[%c0_20, %c0_21] : memref<128x384xf32, #tpu.memory_space<vmem>>, vector<128x384xf32>
    %cst_22 = arith.constant dense<0.000000e+00> : vector<8x384xf32>
    %48 = tpu.matmul %41, %47, %cst_22 {dimension_numbers = #tpu.dot_dimension_numbers<[1], [0], [0], [1], [0, 0, 1, 1], [], []>} : vector<8x128xf32>, vector<128x384xf32>, vector<8x384xf32> -> vector<8x384xf32>
    %49 = vector.extract_strided_slice %46 {offsets = [0, 0], sizes = [8, 128], strides = [1, 1]} : vector<8x384xf32> to vector<8x128xf32>
    %50 = vector.extract_strided_slice %48 {offsets = [0, 0], sizes = [8, 128], strides = [1, 1]} : vector<8x384xf32> to vector<8x128xf32>
    %51 = arith.addf %49, %50 : vector<8x128xf32>
    %52 = arith.negf %51 : vector<8x128xf32>
    %53 = math.exp %52 : vector<8x128xf32>
    %cst_23 = arith.constant 1.000000e+00 : f32
    %54 = vector.broadcast %cst_23 : f32 to vector<8x128xf32>
    %55 = arith.addf %54, %53 : vector<8x128xf32>
    %56 = arith.divf %54, %55 : vector<8x128xf32>
    %57 = vector.extract_strided_slice %46 {offsets = [0, 128], sizes = [8, 128], strides = [1, 1]} : vector<8x384xf32> to vector<8x128xf32>
    %58 = vector.extract_strided_slice %48 {offsets = [0, 128], sizes = [8, 128], strides = [1, 1]} : vector<8x384xf32> to vector<8x128xf32>
    %59 = arith.addf %57, %58 : vector<8x128xf32>
    %60 = arith.negf %59 : vector<8x128xf32>
    %61 = math.exp %60 : vector<8x128xf32>
    %cst_24 = arith.constant 1.000000e+00 : f32
    %62 = vector.broadcast %cst_24 : f32 to vector<8x128xf32>
    %63 = arith.addf %62, %61 : vector<8x128xf32>
    %64 = arith.divf %62, %63 : vector<8x128xf32>
    %65 = vector.extract_strided_slice %46 {offsets = [0, 256], sizes = [8, 128], strides = [1, 1]} : vector<8x384xf32> to vector<8x128xf32>
    %66 = vector.extract_strided_slice %48 {offsets = [0, 256], sizes = [8, 128], strides = [1, 1]} : vector<8x384xf32> to vector<8x128xf32>
    %67 = vector.broadcast %7 : vector<1x128xf32> to vector<8x128xf32>
    %68 = arith.addf %66, %67 : vector<8x128xf32>
    %69 = arith.mulf %56, %68 : vector<8x128xf32>
    %70 = arith.addf %65, %69 : vector<8x128xf32>
    %71 = math.tanh %70 : vector<8x128xf32>
    %cst_25 = arith.constant 1.000000e+00 : f32
    %72 = vector.broadcast %cst_25 : f32 to vector<8x128xf32>
    %73 = arith.subf %72, %64 : vector<8x128xf32>
    %74 = arith.mulf %73, %71 : vector<8x128xf32>
    %75 = arith.mulf %64, %41 : vector<8x128xf32>
    %76 = arith.addf %74, %75 : vector<8x128xf32>
    %77 = arith.index_cast %44 : i32 to index
    %c0_26 = arith.constant 0 : index
    %78 = vector.load %arg7[%77, %c0_26] : memref<48x128xf32, #tpu.memory_space<vmem>>, vector<8x128xf32>
    tpu.vector_store %arg7[%77, %c0_26], %76 {strides = array<i32>} : memref<48x128xf32, #tpu.memory_space<vmem>>, vector<8x128xf32>,
    %c2_i32 = arith.constant 2 : i32
    %c8_i32_27 = arith.constant 8 : i32
    %79 = arith.muli %c2_i32, %c8_i32_27 : i32
    %80 = arith.index_cast %79 : i32 to index
    %c0_28 = arith.constant 0 : index
    %81 = vector.load %arg9[%80, %c0_28] : memref<48x384xf32, #tpu.memory_space<vmem>>, vector<8x384xf32>
    %c0_29 = arith.constant 0 : index
    %c0_30 = arith.constant 0 : index
    %82 = vector.load %arg2[%c0_29, %c0_30] : memref<128x384xf32, #tpu.memory_space<vmem>>, vector<128x384xf32>
    %cst_31 = arith.constant dense<0.000000e+00> : vector<8x384xf32>
    %83 = tpu.matmul %76, %82, %cst_31 {dimension_numbers = #tpu.dot_dimension_numbers<[1], [0], [0], [1], [0, 0, 1, 1], [], []>} : vector<8x128xf32>, vector<128x384xf32>, vector<8x384xf32> -> vector<8x384xf32>
    %84 = vector.extract_strided_slice %81 {offsets = [0, 0], sizes = [8, 128], strides = [1, 1]} : vector<8x384xf32> to vector<8x128xf32>
    %85 = vector.extract_strided_slice %83 {offsets = [0, 0], sizes = [8, 128], strides = [1, 1]} : vector<8x384xf32> to vector<8x128xf32>
    %86 = arith.addf %84, %85 : vector<8x128xf32>
    %87 = arith.negf %86 : vector<8x128xf32>
    %88 = math.exp %87 : vector<8x128xf32>
    %cst_32 = arith.constant 1.000000e+00 : f32
    %89 = vector.broadcast %cst_32 : f32 to vector<8x128xf32>
    %90 = arith.addf %89, %88 : vector<8x128xf32>
    %91 = arith.divf %89, %90 : vector<8x128xf32>
    %92 = vector.extract_strided_slice %81 {offsets = [0, 128], sizes = [8, 128], strides = [1, 1]} : vector<8x384xf32> to vector<8x128xf32>
    %93 = vector.extract_strided_slice %83 {offsets = [0, 128], sizes = [8, 128], strides = [1, 1]} : vector<8x384xf32> to vector<8x128xf32>
    %94 = arith.addf %92, %93 : vector<8x128xf32>
    %95 = arith.negf %94 : vector<8x128xf32>
    %96 = math.exp %95 : vector<8x128xf32>
    %cst_33 = arith.constant 1.000000e+00 : f32
    %97 = vector.broadcast %cst_33 : f32 to vector<8x128xf32>
    %98 = arith.addf %97, %96 : vector<8x128xf32>
    %99 = arith.divf %97, %98 : vector<8x128xf32>
    %100 = vector.extract_strided_slice %81 {offsets = [0, 256], sizes = [8, 128], strides = [1, 1]} : vector<8x384xf32> to vector<8x128xf32>
    %101 = vector.extract_strided_slice %83 {offsets = [0, 256], sizes = [8, 128], strides = [1, 1]} : vector<8x384xf32> to vector<8x128xf32>
    %102 = vector.broadcast %7 : vector<1x128xf32> to vector<8x128xf32>
    %103 = arith.addf %101, %102 : vector<8x128xf32>
    %104 = arith.mulf %91, %103 : vector<8x128xf32>
    %105 = arith.addf %100, %104 : vector<8x128xf32>
    %106 = math.tanh %105 : vector<8x128xf32>
    %cst_34 = arith.constant 1.000000e+00 : f32
    %107 = vector.broadcast %cst_34 : f32 to vector<8x128xf32>
    %108 = arith.subf %107, %99 : vector<8x128xf32>
    %109 = arith.mulf %108, %106 : vector<8x128xf32>
    %110 = arith.mulf %99, %76 : vector<8x128xf32>
    %111 = arith.addf %109, %110 : vector<8x128xf32>
    %112 = arith.index_cast %79 : i32 to index
    %c0_35 = arith.constant 0 : index
    %113 = vector.load %arg7[%112, %c0_35] : memref<48x128xf32, #tpu.memory_space<vmem>>, vector<8x128xf32>
    tpu.vector_store %arg7[%112, %c0_35], %111 {strides = array<i32>} : memref<48x128xf32, #tpu.memory_space<vmem>>, vector<8x128xf32>,
    %c3_i32 = arith.constant 3 : i32
    %c8_i32_36 = arith.constant 8 : i32
    %114 = arith.muli %c3_i32, %c8_i32_36 : i32
    %115 = arith.index_cast %114 : i32 to index
    %c0_37 = arith.constant 0 : index
    %116 = vector.load %arg9[%115, %c0_37] : memref<48x384xf32, #tpu.memory_space<vmem>>, vector<8x384xf32>
    %c0_38 = arith.constant 0 : index
    %c0_39 = arith.constant 0 : index
    %117 = vector.load %arg2[%c0_38, %c0_39] : memref<128x384xf32, #tpu.memory_space<vmem>>, vector<128x384xf32>
    %cst_40 = arith.constant dense<0.000000e+00> : vector<8x384xf32>
    %118 = tpu.matmul %111, %117, %cst_40 {dimension_numbers = #tpu.dot_dimension_numbers<[1], [0], [0], [1], [0, 0, 1, 1], [], []>} : vector<8x128xf32>, vector<128x384xf32>, vector<8x384xf32> -> vector<8x384xf32>
    %119 = vector.extract_strided_slice %116 {offsets = [0, 0], sizes = [8, 128], strides = [1, 1]} : vector<8x384xf32> to vector<8x128xf32>
    %120 = vector.extract_strided_slice %118 {offsets = [0, 0], sizes = [8, 128], strides = [1, 1]} : vector<8x384xf32> to vector<8x128xf32>
    %121 = arith.addf %119, %120 : vector<8x128xf32>
    %122 = arith.negf %121 : vector<8x128xf32>
    %123 = math.exp %122 : vector<8x128xf32>
    %cst_41 = arith.constant 1.000000e+00 : f32
    %124 = vector.broadcast %cst_41 : f32 to vector<8x128xf32>
    %125 = arith.addf %124, %123 : vector<8x128xf32>
    %126 = arith.divf %124, %125 : vector<8x128xf32>
    %127 = vector.extract_strided_slice %116 {offsets = [0, 128], sizes = [8, 128], strides = [1, 1]} : vector<8x384xf32> to vector<8x128xf32>
    %128 = vector.extract_strided_slice %118 {offsets = [0, 128], sizes = [8, 128], strides = [1, 1]} : vector<8x384xf32> to vector<8x128xf32>
    %129 = arith.addf %127, %128 : vector<8x128xf32>
    %130 = arith.negf %129 : vector<8x128xf32>
    %131 = math.exp %130 : vector<8x128xf32>
    %cst_42 = arith.constant 1.000000e+00 : f32
    %132 = vector.broadcast %cst_42 : f32 to vector<8x128xf32>
    %133 = arith.addf %132, %131 : vector<8x128xf32>
    %134 = arith.divf %132, %133 : vector<8x128xf32>
    %135 = vector.extract_strided_slice %116 {offsets = [0, 256], sizes = [8, 128], strides = [1, 1]} : vector<8x384xf32> to vector<8x128xf32>
    %136 = vector.extract_strided_slice %118 {offsets = [0, 256], sizes = [8, 128], strides = [1, 1]} : vector<8x384xf32> to vector<8x128xf32>
    %137 = vector.broadcast %7 : vector<1x128xf32> to vector<8x128xf32>
    %138 = arith.addf %136, %137 : vector<8x128xf32>
    %139 = arith.mulf %126, %138 : vector<8x128xf32>
    %140 = arith.addf %135, %139 : vector<8x128xf32>
    %141 = math.tanh %140 : vector<8x128xf32>
    %cst_43 = arith.constant 1.000000e+00 : f32
    %142 = vector.broadcast %cst_43 : f32 to vector<8x128xf32>
    %143 = arith.subf %142, %134 : vector<8x128xf32>
    %144 = arith.mulf %143, %141 : vector<8x128xf32>
    %145 = arith.mulf %134, %111 : vector<8x128xf32>
    %146 = arith.addf %144, %145 : vector<8x128xf32>
    %147 = arith.index_cast %114 : i32 to index
    %c0_44 = arith.constant 0 : index
    %148 = vector.load %arg7[%147, %c0_44] : memref<48x128xf32, #tpu.memory_space<vmem>>, vector<8x128xf32>
    tpu.vector_store %arg7[%147, %c0_44], %146 {strides = array<i32>} : memref<48x128xf32, #tpu.memory_space<vmem>>, vector<8x128xf32>,
    %c4_i32 = arith.constant 4 : i32
    %c8_i32_45 = arith.constant 8 : i32
    %149 = arith.muli %c4_i32, %c8_i32_45 : i32
    %150 = arith.index_cast %149 : i32 to index
    %c0_46 = arith.constant 0 : index
    %151 = vector.load %arg9[%150, %c0_46] : memref<48x384xf32, #tpu.memory_space<vmem>>, vector<8x384xf32>
    %c0_47 = arith.constant 0 : index
    %c0_48 = arith.constant 0 : index
    %152 = vector.load %arg2[%c0_47, %c0_48] : memref<128x384xf32, #tpu.memory_space<vmem>>, vector<128x384xf32>
    %cst_49 = arith.constant dense<0.000000e+00> : vector<8x384xf32>
    %153 = tpu.matmul %146, %152, %cst_49 {dimension_numbers = #tpu.dot_dimension_numbers<[1], [0], [0], [1], [0, 0, 1, 1], [], []>} : vector<8x128xf32>, vector<128x384xf32>, vector<8x384xf32> -> vector<8x384xf32>
    %154 = vector.extract_strided_slice %151 {offsets = [0, 0], sizes = [8, 128], strides = [1, 1]} : vector<8x384xf32> to vector<8x128xf32>
    %155 = vector.extract_strided_slice %153 {offsets = [0, 0], sizes = [8, 128], strides = [1, 1]} : vector<8x384xf32> to vector<8x128xf32>
    %156 = arith.addf %154, %155 : vector<8x128xf32>
    %157 = arith.negf %156 : vector<8x128xf32>
    %158 = math.exp %157 : vector<8x128xf32>
    %cst_50 = arith.constant 1.000000e+00 : f32
    %159 = vector.broadcast %cst_50 : f32 to vector<8x128xf32>
    %160 = arith.addf %159, %158 : vector<8x128xf32>
    %161 = arith.divf %159, %160 : vector<8x128xf32>
    %162 = vector.extract_strided_slice %151 {offsets = [0, 128], sizes = [8, 128], strides = [1, 1]} : vector<8x384xf32> to vector<8x128xf32>
    %163 = vector.extract_strided_slice %153 {offsets = [0, 128], sizes = [8, 128], strides = [1, 1]} : vector<8x384xf32> to vector<8x128xf32>
    %164 = arith.addf %162, %163 : vector<8x128xf32>
    %165 = arith.negf %164 : vector<8x128xf32>
    %166 = math.exp %165 : vector<8x128xf32>
    %cst_51 = arith.constant 1.000000e+00 : f32
    %167 = vector.broadcast %cst_51 : f32 to vector<8x128xf32>
    %168 = arith.addf %167, %166 : vector<8x128xf32>
    %169 = arith.divf %167, %168 : vector<8x128xf32>
    %170 = vector.extract_strided_slice %151 {offsets = [0, 256], sizes = [8, 128], strides = [1, 1]} : vector<8x384xf32> to vector<8x128xf32>
    %171 = vector.extract_strided_slice %153 {offsets = [0, 256], sizes = [8, 128], strides = [1, 1]} : vector<8x384xf32> to vector<8x128xf32>
    %172 = vector.broadcast %7 : vector<1x128xf32> to vector<8x128xf32>
    %173 = arith.addf %171, %172 : vector<8x128xf32>
    %174 = arith.mulf %161, %173 : vector<8x128xf32>
    %175 = arith.addf %170, %174 : vector<8x128xf32>
    %176 = math.tanh %175 : vector<8x128xf32>
    %cst_52 = arith.constant 1.000000e+00 : f32
    %177 = vector.broadcast %cst_52 : f32 to vector<8x128xf32>
    %178 = arith.subf %177, %169 : vector<8x128xf32>
    %179 = arith.mulf %178, %176 : vector<8x128xf32>
    %180 = arith.mulf %169, %146 : vector<8x128xf32>
    %181 = arith.addf %179, %180 : vector<8x128xf32>
    %182 = arith.index_cast %149 : i32 to index
    %c0_53 = arith.constant 0 : index
    %183 = vector.load %arg7[%182, %c0_53] : memref<48x128xf32, #tpu.memory_space<vmem>>, vector<8x128xf32>
    tpu.vector_store %arg7[%182, %c0_53], %181 {strides = array<i32>} : memref<48x128xf32, #tpu.memory_space<vmem>>, vector<8x128xf32>,
    %c5_i32 = arith.constant 5 : i32
    %c8_i32_54 = arith.constant 8 : i32
    %184 = arith.muli %c5_i32, %c8_i32_54 : i32
    %185 = arith.index_cast %184 : i32 to index
    %c0_55 = arith.constant 0 : index
    %186 = vector.load %arg9[%185, %c0_55] : memref<48x384xf32, #tpu.memory_space<vmem>>, vector<8x384xf32>
    %c0_56 = arith.constant 0 : index
    %c0_57 = arith.constant 0 : index
    %187 = vector.load %arg2[%c0_56, %c0_57] : memref<128x384xf32, #tpu.memory_space<vmem>>, vector<128x384xf32>
    %cst_58 = arith.constant dense<0.000000e+00> : vector<8x384xf32>
    %188 = tpu.matmul %181, %187, %cst_58 {dimension_numbers = #tpu.dot_dimension_numbers<[1], [0], [0], [1], [0, 0, 1, 1], [], []>} : vector<8x128xf32>, vector<128x384xf32>, vector<8x384xf32> -> vector<8x384xf32>
    %189 = vector.extract_strided_slice %186 {offsets = [0, 0], sizes = [8, 128], strides = [1, 1]} : vector<8x384xf32> to vector<8x128xf32>
    %190 = vector.extract_strided_slice %188 {offsets = [0, 0], sizes = [8, 128], strides = [1, 1]} : vector<8x384xf32> to vector<8x128xf32>
    %191 = arith.addf %189, %190 : vector<8x128xf32>
    %192 = arith.negf %191 : vector<8x128xf32>
    %193 = math.exp %192 : vector<8x128xf32>
    %cst_59 = arith.constant 1.000000e+00 : f32
    %194 = vector.broadcast %cst_59 : f32 to vector<8x128xf32>
    %195 = arith.addf %194, %193 : vector<8x128xf32>
    %196 = arith.divf %194, %195 : vector<8x128xf32>
    %197 = vector.extract_strided_slice %186 {offsets = [0, 128], sizes = [8, 128], strides = [1, 1]} : vector<8x384xf32> to vector<8x128xf32>
    %198 = vector.extract_strided_slice %188 {offsets = [0, 128], sizes = [8, 128], strides = [1, 1]} : vector<8x384xf32> to vector<8x128xf32>
    %199 = arith.addf %197, %198 : vector<8x128xf32>
    %200 = arith.negf %199 : vector<8x128xf32>
    %201 = math.exp %200 : vector<8x128xf32>
    %cst_60 = arith.constant 1.000000e+00 : f32
    %202 = vector.broadcast %cst_60 : f32 to vector<8x128xf32>
    %203 = arith.addf %202, %201 : vector<8x128xf32>
    %204 = arith.divf %202, %203 : vector<8x128xf32>
    %205 = vector.extract_strided_slice %186 {offsets = [0, 256], sizes = [8, 128], strides = [1, 1]} : vector<8x384xf32> to vector<8x128xf32>
    %206 = vector.extract_strided_slice %188 {offsets = [0, 256], sizes = [8, 128], strides = [1, 1]} : vector<8x384xf32> to vector<8x128xf32>
    %207 = vector.broadcast %7 : vector<1x128xf32> to vector<8x128xf32>
    %208 = arith.addf %206, %207 : vector<8x128xf32>
    %209 = arith.mulf %196, %208 : vector<8x128xf32>
    %210 = arith.addf %205, %209 : vector<8x128xf32>
    %211 = math.tanh %210 : vector<8x128xf32>
    %cst_61 = arith.constant 1.000000e+00 : f32
    %212 = vector.broadcast %cst_61 : f32 to vector<8x128xf32>
    %213 = arith.subf %212, %204 : vector<8x128xf32>
    %214 = arith.mulf %213, %211 : vector<8x128xf32>
    %215 = arith.mulf %204, %181 : vector<8x128xf32>
    %216 = arith.addf %214, %215 : vector<8x128xf32>
    %217 = arith.index_cast %184 : i32 to index
    %c0_62 = arith.constant 0 : index
    %218 = vector.load %arg7[%217, %c0_62] : memref<48x128xf32, #tpu.memory_space<vmem>>, vector<8x128xf32>
    tpu.vector_store %arg7[%217, %c0_62], %216 {strides = array<i32>} : memref<48x128xf32, #tpu.memory_space<vmem>>, vector<8x128xf32>,
    %c6_i32 = arith.constant 6 : i32
    %c0_63 = arith.constant 0 : index
    %c0_64 = arith.constant 0 : index
    %219 = vector.load %arg7[%c0_63, %c0_64] : memref<48x128xf32, #tpu.memory_space<vmem>>, vector<48x128xf32>
    %c0_65 = arith.constant 0 : index
    %c0_66 = arith.constant 0 : index
    %220 = vector.load %arg5[%c0_65, %c0_66] : memref<128x1024xf32, #tpu.memory_space<vmem>>, vector<128x1024xf32>
    %cst_67 = arith.constant dense<0.000000e+00> : vector<48x1024xf32>
    %221 = tpu.matmul %219, %220, %cst_67 {dimension_numbers = #tpu.dot_dimension_numbers<[1], [0], [0], [1], [0, 0, 1, 1], [], []>} : vector<48x128xf32>, vector<128x1024xf32>, vector<48x1024xf32> -> vector<48x1024xf32>
    %c0_68 = arith.constant 0 : index
    %c0_69 = arith.constant 0 : index
    %222 = vector.load %arg6[%c0_68, %c0_69] : memref<1x1024xf32, #tpu.memory_space<vmem>>, vector<1x1024xf32>
    %223 = vector.broadcast %222 : vector<1x1024xf32> to vector<48x1024xf32>
    %224 = arith.addf %221, %223 : vector<48x1024xf32>
    %c0_70 = arith.constant 0 : index
    %c0_71 = arith.constant 0 : index
    %225 = vector.load %arg8[%c0_70, %c0_71] : memref<48x1024xf32, #tpu.memory_space<vmem>>, vector<48x1024xf32>
    tpu.vector_store %arg8[%c0_70, %c0_71], %224 {strides = array<i32>} : memref<48x1024xf32, #tpu.memory_space<vmem>>, vector<48x1024xf32>,
    return
  }
}

</mosaic_0001>

<bundles_post_ra>
// kernel: tatlstm_forward.1
= control target key start
LH: loop header
LB: loop body
LE: loop exit
PB: predicated region body
PF: predicated region fallthrough
CT: control target
= control target key end

     0   :  { %v4517_v4 = vmov 0.0   ;;  %s4508_s0 = inlined_call_operand.vmem [shape: f32[48,128], index: 0, kind: input, shape index: {}]   ;;  %s4509_s1 = inlined_call_operand.vmem [shape: f32[128,384], index: 1, kind: input, shape index: {}]   ;;  %s4510_s2 = inlined_call_operand.vmem [shape: f32[128,384], index: 2, kind: input, shape index: {}]   ;;  %s4511_s3 = inlined_call_operand.vmem [shape: f32[1,384], index: 3, kind: input, shape index: {}]   ;;  %s4512_s4 = inlined_call_operand.vmem [shape: f32[1,128], index: 4, kind: input, shape index: {}]   ;;  %s4513_s5 = inlined_call_operand.vmem [shape: f32[128,1024], index: 5, kind: input, shape index: {}]   ;;  %s4514_s6 = inlined_call_operand.vmem [shape: f32[1,1024], index: 6, kind: input, shape index: {}]   ;;  %s4515_s7 = inlined_call_operand.vmem [shape: f32[48,128], index: 7, kind: output, shape index: {0}]   ;;  %s4516_s8 = inlined_call_operand.hbm [shape: f32[48,1024], index: 8, kind: output, shape index: {1}]  }
   0x1   :  { %v81_v0 = vld [vmem:[%s4509_s1 + $0x170] sm:$0xff]  ;;  %v80_v1 = vld [vmem:[%s4509_s1 + $0x168] sm:$0xff]  ;;  %v78_v2 = vld [vmem:[%s4509_s1 + $0x158] sm:$0xff]  ;;  %164 = vmatprep.mubr.f32.mxu0 %v4517_v4 }
   0x2   :  { %100 = vmatprep.subr.mxu0 %v81_v0  ;;  %v77_v3 = vld [vmem:[%s4509_s1 + $0x150] sm:$0xff]  ;;  %v75_v5 = vld [vmem:[%s4509_s1 + $0x140] sm:$0xff]  ;;  %v74_v6 = vld [vmem:[%s4509_s1 + $0x138] sm:$0xff] }
   0x3   :  { %101 = vmatpush1.msra.mxu0 %v80_v1  ;;  %v72_v7 = vld [vmem:[%s4509_s1 + $0x128] sm:$0xff]  ;;  %v71_v8 = vld [vmem:[%s4509_s1 + $0x120] sm:$0xff]  ;;  %v69_v9 = vld [vmem:[%s4509_s1 + $0x110] sm:$0xff] }
   0x4   :  { %102 = vmatprep.subr.mxu0 %v78_v2  ;;  %v68_v10 = vld [vmem:[%s4509_s1 + $0x108] sm:$0xff]  ;;  %v66_v11 = vld [vmem:[%s4509_s1 + $0xf8] sm:$0xff]  ;;  %v65_v12 = vld [vmem:[%s4509_s1 + $0xf0] sm:$0xff] }
   0x5   :  { %103 = vmatpush1.msra.mxu0 %v77_v3  ;;  %v63_v13 = vld [vmem:[%s4509_s1 + $0xe0] sm:$0xff]  ;;  %v82_v14 = vld [vmem:[%s4509_s1 + $0x178] sm:$0xff]  ;;  %v60_v17 = vld [vmem:[%s4509_s1 + $0xc8] sm:$0xff] }
   0x6   :  { %104 = vmatprep.subr.mxu0 %v75_v5  ;;  %v62_v15 = vld [vmem:[%s4509_s1 + $0xd8] sm:$0xff]  ;;  %2396 = vmatprep.subr.mxu1 %v82_v14  ;;  %v79_v16 = vld [vmem:[%s4509_s1 + $0x160] sm:$0xff]  ;;  %v76_v18 = vld [vmem:[%s4509_s1 + $0x148] sm:$0xff] }
   0x7   :  { %105 = vmatpush1.msra.mxu0 %v74_v6  ;;  %2397 = vmatpush3.msra.mxu1 %v82_v14  ;;  %v59_v19 = vld [vmem:[%s4509_s1 + $0xc0] sm:$0xff]  ;;  %v57_v20 = vld [vmem:[%s4509_s1 + $0xb0] sm:$0xff]  ;;  %v56_v22 = vld [vmem:[%s4509_s1 + $0xa8] sm:$0xff] }
   0x8   :  { %106 = vmatprep.subr.mxu0 %v72_v7  ;;  %2398 = vmatprep.subr.mxu1 %v79_v16  ;;  %v73_v21 = vld [vmem:[%s4509_s1 + $0x130] sm:$0xff]  ;;  %v54_v23 = vld [vmem:[%s4509_s1 + $0x98] sm:$0xff]  ;;  %v51_v26 = vld [vmem:[%s4509_s1 + $0x80] sm:$0xff] }
   0x9   :  { %107 = vmatpush1.msra.mxu0 %v71_v8  ;;  %2399 = vmatpush3.msra.mxu1 %v79_v16  ;;  %v70_v24 = vld [vmem:[%s4509_s1 + $0x118] sm:$0xff]  ;;  %v53_v25 = vld [vmem:[%s4509_s1 + $0x90] sm:$0xff]  ;;  %v67_v27 = vld [vmem:[%s4509_s1 + $0x100] sm:$0xff] }
   0xa   :  { %108 = vmatprep.subr.mxu0 %v69_v9  ;;  %2400 = vmatprep.subr.mxu1 %v76_v18  ;;  %v50_v28 = vld [vmem:[%s4509_s1 + $0x78] sm:$0xff]  ;;  %v48_v29 = vld [vmem:[%s4509_s1 + $0x68] sm:$0xff]  ;;  %v47_v31 = vld [vmem:[%s4509_s1 + $0x60] sm:$0xff] }
   0xb   :  { %109 = vmatpush1.msra.mxu0 %v68_v10  ;;  %2401 = vmatpush3.msra.mxu1 %v76_v18  ;;  %v64_v30 = vld [vmem:[%s4509_s1 + $0xe8] sm:$0xff]  ;;  %v45_v32 = vld [vmem:[%s4509_s1 + $0x50] sm:$0xff]  ;;  %v42_v35 = vld [vmem:[%s4509_s1 + $0x38] sm:$0xff] }
   0xc   :  { %110 = vmatprep.subr.mxu0 %v66_v11  ;;  %2402 = vmatprep.subr.mxu1 %v73_v21  ;;  %v61_v33 = vld [vmem:[%s4509_s1 + $0xd0] sm:$0xff]  ;;  %v44_v34 = vld [vmem:[%s4509_s1 + $0x48] sm:$0xff]  ;;  %v58_v36 = vld [vmem:[%s4509_s1 + $0xb8] sm:$0xff] }
   0xd   :  { %111 = vmatpush1.msra.mxu0 %v65_v12  ;;  %2403 = vmatpush3.msra.mxu1 %v73_v21  ;;  %v41_v37 = vld [vmem:[%s4509_s1 + $0x30] sm:$0xff]  ;;  %v39_v38 = vld [vmem:[%s4509_s1 + $0x20] sm:$0xff]  ;;  %v38_v40 = vld [vmem:[%s4509_s1 + $0x18] sm:$0xff] }
   0xe   :  { %112 = vmatprep.subr.mxu0 %v63_v13  ;;  %2404 = vmatprep.subr.mxu1 %v70_v24  ;;  %v55_v39 = vld [vmem:[%s4509_s1 + $0xa0] sm:$0xff]  ;;  %v36_v41 = vld [vmem:[%s4509_s1 + $0x8] sm:$0xff]  ;;  %v2924_v45 = vld [vmem:[%s4510_s2 + $0x170] sm:$0xff] }
   0xf   :  { %113 = vmatpush1.msra.mxu0 %v62_v15  ;;  %2405 = vmatpush3.msra.mxu1 %v70_v24  ;;  %v52_v42 = vld [vmem:[%s4509_s1 + $0x88] sm:$0xff]  ;;  %v35_v43 = vld [vmem:[%s4509_s1] sm:$0xff]  ;;  %v2934_v47 = vld [vmem:[%s4510_s2 + $0x158] sm:$0xff] }
  0x10   :  { %114 = vmatprep.subr.mxu0 %v60_v17  ;;  %2406 = vmatprep.subr.mxu1 %v67_v27  ;;  %v2919_v44 = vld [vmem:[%s4508_s0] sm:$0xff]  ;;  %v2929_v46 = vld [vmem:[%s4510_s2 + $0x168] sm:$0xff]  ;;  %v49_v48 = vld [vmem:[%s4509_s1 + $0x70] sm:$0xff] }
  0x11   :  { %115 = vmatpush1.msra.mxu0 %v59_v19  ;;  %2407 = vmatpush3.msra.mxu1 %v67_v27  ;;  %v2944_v49 = vld [vmem:[%s4510_s2 + $0x150] sm:$0xff]  ;;  %v2950_v50 = vld [vmem:[%s4510_s2 + $0x140] sm:$0xff]  ;;  %v2956_v51 = vld [vmem:[%s4508_s0 + $0x8] sm:$0xff] }
  0x12   :  { %116 = vmatprep.subr.mxu0 %v57_v20  ;;  %2408 = vmatprep.subr.mxu1 %v64_v30 }
  0x13   :  { %117 = vmatpush1.msra.mxu0 %v56_v22  ;;  %2409 = vmatpush3.msra.mxu1 %v64_v30 }
  0x14   :  { %118 = vmatprep.subr.mxu0 %v54_v23  ;;  %2410 = vmatprep.subr.mxu1 %v61_v33 }
  0x15   :  { %119 = vmatpush1.msra.mxu0 %v53_v25  ;;  %2411 = vmatpush3.msra.mxu1 %v61_v33 }
  0x16   :  { %120 = vmatprep.subr.mxu0 %v51_v26  ;;  %2412 = vmatprep.subr.mxu1 %v58_v36 }
  0x17   :  { %121 = vmatpush1.msra.mxu0 %v50_v28  ;;  %2413 = vmatpush3.msra.mxu1 %v58_v36 }
  0x18   :  { %122 = vmatprep.subr.mxu0 %v48_v29  ;;  %2414 = vmatprep.subr.mxu1 %v55_v39 }
  0x19   :  { %123 = vmatpush1.msra.mxu0 %v47_v31  ;;  %2415 = vmatpush3.msra.mxu1 %v55_v39 }
  0x1a   :  { %124 = vmatprep.subr.mxu0 %v45_v32  ;;  %2416 = vmatprep.subr.mxu1 %v52_v42 }
  0x1b   :  { %125 = vmatpush1.msra.mxu0 %v44_v34  ;;  %2417 = vmatpush3.msra.mxu1 %v52_v42 }
  0x1c   :  { %126 = vmatprep.subr.mxu0 %v42_v35 }
  0x1d   :  { %127 = vmatpush1.msra.mxu0 %v41_v37 }
  0x1e   :  { %128 = vmatprep.subr.mxu0 %v39_v38 }
  0x1f   :  { %129 = vmatpush1.msra.mxu0 %v38_v40 }
  0x20   :  { %130 = vmatprep.subr.mxu0 %v36_v41 }
  0x21   :  { %131 = vmatpush1.msra.mxu0 %v35_v43 }
  0x22   :  { %165 = vmatmul.mubr.f32.vlgmr.msra.gmra.mxu0 %v2919_v44  ;;  %366 = vmatprep.subr.mxu0 %v2924_v45 }
  0x23   :  { %367 = vmatpush1.msra.mxu0 %v2929_v46  ;;  %170 = vmatprep.mubr.f32.mxu0 %v4517_v4 }
  0x24   :  { %14 = vsyncpa [#allocation4], 0  ;;  %368 = vmatprep.subr.mxu0 %v2934_v47  ;;  %v2962_v52 = vld [vmem:[%s4510_s2 + $0x138] sm:$0xff]  ;;  %2418 = vmatprep.subr.mxu1 %v49_v48  ;;  %v2968_v53 = vld [vmem:[%s4510_s2 + $0x128] sm:$0xff]  ;;  %vm2737_vm0 = vmmov 0   ;;  %v85_v40 = vlaneseq }
  0x25   :  { %369 = vmatpush1.msra.mxu0 %v2944_v49  ;;  %2419 = vmatpush3.msra.mxu1 %v49_v48  ;;  %v46_v54 = vld [vmem:[%s4509_s1 + $0x58] sm:$0xff]  ;;  %v2977_v55 = vld [vmem:[%s4510_s2 + $0x120] sm:$0xff]  ;;  %v2984_v56 = vld [vmem:[%s4510_s2 + $0x110] sm:$0xff] }
  0x26   :  { %370 = vmatprep.subr.mxu0 %v2950_v50  ;;  %171 = vmatmul.mubr.f32.gmra.mxu0 %v2956_v51  ;;  %v2990_v57 = vld [vmem:[%s4508_s0 + $0x10] sm:$0xff]  ;;  %v2996_v58 = vld [vmem:[%s4510_s2 + $0x108] sm:$0xff]  ;;  %v3002_v59 = vld [vmem:[%s4510_s2 + $0xf8] sm:$0xff]  ;;  %v3352_v41 = vshrl.u32 %v85_v40, 7 }
  0x27   :  { %371 = vmatpush1.msra.mxu0 %v2962_v52  ;;  %176 = vmatprep.mubr.f32.mxu0 %v4517_v4  ;;  %v43_v60 = vld [vmem:[%s4509_s1 + $0x40] sm:$0xff]  ;;  %v3011_v61 = vld [vmem:[%s4510_s2 + $0xf0] sm:$0xff]  ;;  %v3024_v63 = vld [vmem:[%s4508_s0 + $0x18] sm:$0xff] }
  0x28   :  { %372 = vmatprep.subr.mxu0 %v2968_v53  ;;  %2420 = vmatprep.subr.mxu1 %v46_v54  ;;  %v3018_v62 = vld [vmem:[%s4510_s2 + $0xe0] sm:$0xff]  ;;  %v3030_v0 = vld [vmem:[%s4510_s2 + $0xd8] sm:$0xff]  ;;  %v3036_v1 = vld [vmem:[%s4510_s2 + $0xc8] sm:$0xff]  ;;  %4546 = vst [vmem:[#allocation12_spill] sm:$0xff] %v3352_v41  ;;  %v4523_v42 = vsub.s32 0, %v3352_v41 }
  0x29   :  { %373 = vmatpush1.msra.mxu0 %v2977_v55  ;;  %2421 = vmatpush3.msra.mxu1 %v46_v54  ;;  %v40_v2 = vld [vmem:[%s4509_s1 + $0x28] sm:$0xff]  ;;  %v3045_v3 = vld [vmem:[%s4510_s2 + $0xc0] sm:$0xff]  ;;  %v3052_v5 = vld [vmem:[%s4510_s2 + $0xb0] sm:$0xff] }
  0x2a   :  { %374 = vmatprep.subr.mxu0 %v2984_v56  ;;  %177 = vmatmul.mubr.f32.gmra.mxu0 %v2990_v57  ;;  %v3058_v6 = vld [vmem:[%s4508_s0 + $0x20] sm:$0xff]  ;;  %v3064_v7 = vld [vmem:[%s4510_s2 + $0xa8] sm:$0xff]  ;;  %v3070_v8 = vld [vmem:[%s4510_s2 + $0x98] sm:$0xff] }
  0x2b   :  { %375 = vmatpush1.msra.mxu0 %v2996_v58  ;;  %182 = vmatprep.mubr.f32.mxu0 %v4517_v4  ;;  %v37_v9 = vld [vmem:[%s4509_s1 + $0x10] sm:$0xff]  ;;  %v3086_v11 = vld [vmem:[%s4510_s2 + $0x80] sm:$0xff]  ;;  %v34_v12 = vld [vmem:[%s4508_s0 + $0x28] sm:$0xff] }
  0x2c   :  { %376 = vmatprep.subr.mxu0 %v3002_v59  ;;  %2422 = vmatprep.subr.mxu1 %v43_v60  ;;  %v3079_v10 = vld [vmem:[%s4510_s2 + $0x90] sm:$0xff]  ;;  %v3096_v13 = vld [vmem:[%s4510_s2 + $0x78] sm:$0xff]  ;;  %v3102_v14 = vld [vmem:[%s4510_s2 + $0x68] sm:$0xff] }
  0x2d   :  { %377 = vmatpush1.msra.mxu0 %v3011_v61  ;;  %2423 = vmatpush3.msra.mxu1 %v43_v60  ;;  %v3108_v15 = vld [vmem:[%s4510_s2 + $0x60] sm:$0xff]  ;;  %v3114_v16 = vld [vmem:[%s4510_s2 + $0x50] sm:$0xff]  ;;  %v3121_v17 = vld [vmem:[%s4510_s2 + $0x48] sm:$0xff] }
  0x2e   :  { %378 = vmatprep.subr.mxu0 %v3018_v62  ;;  %183 = vmatmul.mubr.f32.gmra.mxu0 %v3024_v63  ;;  %v3127_v18 = vld [vmem:[%s4510_s2 + $0x178] sm:$0xff]  ;;  %v3140_v20 = vld [vmem:[%s4510_s2 + $0x30] sm:$0xff]  ;;  %v3146_v21 = vld [vmem:[%s4510_s2 + $0x160] sm:$0xff] }
  0x2f   :  { %379 = vmatpush1.msra.mxu0 %v3030_v0  ;;  %188 = vmatprep.mubr.f32.mxu0 %v4517_v4  ;;  %v3133_v19 = vld [vmem:[%s4510_s2 + $0x38] sm:$0xff]  ;;  %v3152_v22 = vld [vmem:[%s4510_s2 + $0x20] sm:$0xff]  ;;  %v3165_v24 = vld [vmem:[%s4510_s2 + $0x148] sm:$0xff] }
  0x30   :  { %380 = vmatprep.subr.mxu0 %v3036_v1  ;;  %2424 = vmatprep.subr.mxu1 %v40_v2  ;;  %4540 = vst [vmem:[#allocation6_spill] sm:$0xff] %v3152_v22  ;;  %v3159_v23 = vld [vmem:[%s4510_s2 + $0x18] sm:$0xff]  ;;  %v3171_v25 = vld [vmem:[%s4510_s2 + $0x8] sm:$0xff]  ;;  %v3178_v26 = vld [vmem:[%s4510_s2] sm:$0xff] }
  0x31   :  { %381 = vmatpush1.msra.mxu0 %v3045_v3  ;;  %2425 = vmatpush3.msra.mxu1 %v40_v2  ;;  %4541 = vst [vmem:[#allocation7_spill] sm:$0xff] %v3159_v23  ;;  %4542 = vst [vmem:[#allocation8_spill] sm:$0xff] %v3171_v25  ;;  %v3184_v27 = vld [vmem:[%s4510_s2 + $0x130] sm:$0xff]  ;;  %v3193_v28 = vld [vmem:[%s4510_s2 + $0x118] sm:$0xff] }
  0x32   :  { %382 = vmatprep.subr.mxu0 %v3052_v5  ;;  %189 = vmatmul.mubr.f32.gmra.mxu0 %v3058_v6  ;;  %4543 = vst [vmem:[#allocation9_spill] sm:$0xff] %v3178_v26  ;;  %v3202_v29 = vld [vmem:[%s4510_s2 + $0x100] sm:$0xff]  ;;  %v3210_v30 = vld [vmem:[%s4510_s2 + $0xe8] sm:$0xff]  ;;  %v3219_v31 = vld [vmem:[%s4510_s2 + $0xd0] sm:$0xff] }
  0x33   :  { %383 = vmatpush1.msra.mxu0 %v3064_v7  ;;  %194 = vmatprep.mubr.f32.mxu0 %v4517_v4  ;;  %v3228_v32 = vld [vmem:[%s4510_s2 + $0xb8] sm:$0xff]  ;;  %v3237_v33 = vld [vmem:[%s4510_s2 + $0xa0] sm:$0xff]  ;;  %v3246_v34 = vld [vmem:[%s4510_s2 + $0x88] sm:$0xff] }
  0x34   :  { %384 = vmatprep.subr.mxu0 %v3070_v8  ;;  %2426 = vmatprep.subr.mxu1 %v37_v9  ;;  %v3255_v35 = vld [vmem:[%s4510_s2 + $0x70] sm:$0xff]  ;;  %v3264_v36 = vld [vmem:[%s4510_s2 + $0x58] sm:$0xff]  ;;  %v3273_v37 = vld [vmem:[%s4510_s2 + $0x40] sm:$0xff] }
  0x35   :  { %385 = vmatpush1.msra.mxu0 %v3079_v10  ;;  %2427 = vmatpush3.msra.mxu1 %v37_v9  ;;  %v3282_v38 = vld [vmem:[%s4510_s2 + $0x28] sm:$0xff]  ;;  %v3291_v39 = vld [vmem:[%s4510_s2 + $0x10] sm:$0xff]  ;;  %v83_v43 = vld [vmem:[%s4511_s3] sm:$0x7] }
  0x36   :  { %386 = vmatprep.subr.mxu0 %v3086_v11  ;;  %195 = vmatmul.mubr.f32.gmra.mxu0 %v34_v12  ;;  %4544 = vst [vmem:[#allocation10_spill] sm:$0xff] %v3282_v38  ;;  %4545 = vst [vmem:[#allocation11_spill] sm:$0xff] %v3291_v39 }
  0x37   :  { %387 = vmatpush1.msra.mxu0 %v3096_v13  ;;  %2428 = vmatprep.mubr.f32.mxu1 %v2919_v44 }
  0x38   :  { %388 = vmatprep.subr.mxu0 %v3102_v14  ;;  %2437 = vmatprep.subr.mxu1 %v4517_v4 }
  0x39   :  { %389 = vmatpush1.msra.mxu0 %v3108_v15  ;;  %2429 = vmatmul.mubr.f32.vlgmr.msra.gmra.mxu1 %v2956_v51  ;;  %v88_v51 = vrot.slane %v83_v43, %v4523_v42 }
  0x3a   :  { %390 = vmatprep.subr.mxu0 %v3114_v16  ;;  %430 = vmatprep.mubr.f32.mxu0 %v4517_v4 }
  0x3b   :  { %391 = vmatpush1.msra.mxu0 %v3121_v17  ;;  %2438 = vmatpush3.msra.mxu1 %v3127_v18 }
  0x3c   :  { %392 = vmatprep.subr.mxu0 %v3133_v19  ;;  %2439 = vmatprep.subr.mxu1 %v4517_v4 }
  0x3d   :  { %393 = vmatpush1.msra.mxu0 %v3140_v20  ;;  %2440 = vmatpush3.msra.mxu1 %v3146_v21 }
  0x3e   :  { %394 = vmatprep.subr.mxu0 %v3152_v22  ;;  %2441 = vmatprep.subr.mxu1 %v4517_v4 }
  0x3f   :  { %395 = vmatpush1.msra.mxu0 %v3159_v23  ;;  %2442 = vmatpush3.msra.mxu1 %v3165_v24 }
  0x40   :  { %396 = vmatprep.subr.mxu0 %v3171_v25  ;;  %2443 = vmatprep.subr.mxu1 %v4517_v4 }
  0x41   :  { %397 = vmatpush1.msra.mxu0 %v3178_v26  ;;  %2444 = vmatpush3.msra.mxu1 %v3184_v27 }
  0x42   :  { %431 = vmatmul.mubr.f32.vlgmr.msra.gmra.mxu0 %v4517_v4  ;;  %2445 = vmatprep.subr.mxu1 %v4517_v4 }
  0x43   :  { %2446 = vmatpush3.msra.mxu1 %v3193_v28  ;;  %2431 = vmatprep.mubr.f32.mxu1 %v2990_v57 }
  0x44   :  { %2447 = vmatprep.subr.mxu1 %v4517_v4  ;;  %2432 = vmatmul.mubr.f32.gmra.mxu1 %v3024_v63 }
  0x45   :  { %2448 = vmatpush3.msra.mxu1 %v3202_v29  ;;  %2434 = vmatprep.mubr.f32.mxu1 %v3058_v6 }
  0x46   :  { %2449 = vmatprep.subr.mxu1 %v4517_v4  ;;  %587 = vmatprep.subr.mxu0 %v2924_v45 }
  0x47   :  { %2450 = vmatpush3.msra.mxu1 %v3210_v30  ;;  %588 = vmatpush1.msra.mxu0 %v2929_v46 }
  0x48   :  { %2451 = vmatprep.subr.mxu1 %v4517_v4  ;;  %2435 = vmatmul.mubr.f32.gmra.mxu1 %v34_v12 }
  0x49   :  { %2452 = vmatpush3.msra.mxu1 %v3219_v31  ;;  %2469 = vmatprep.mubr.msk.f32.mxu1 %vm2737_vm0, %v4517_v4 }
  0x4a   :  { %2453 = vmatprep.subr.mxu1 %v4517_v4  ;;  %589 = vmatprep.subr.mxu0 %v2934_v47 }
  0x4b   :  { %2454 = vmatpush3.msra.mxu1 %v3228_v32  ;;  %590 = vmatpush1.msra.mxu0 %v2944_v49 }
  0x4c   :  { %2455 = vmatprep.subr.mxu1 %v4517_v4  ;;  %591 = vmatprep.subr.mxu0 %v2950_v50 }
  0x4d   :  { %2456 = vmatpush3.msra.mxu1 %v3237_v33  ;;  %592 = vmatpush1.msra.mxu0 %v2962_v52 }
  0x4e   :  { %2457 = vmatprep.subr.mxu1 %v4517_v4  ;;  %593 = vmatprep.subr.mxu0 %v2968_v53 }
  0x4f   :  { %2458 = vmatpush3.msra.mxu1 %v3246_v34  ;;  %594 = vmatpush1.msra.mxu0 %v2977_v55 }
  0x50   :  { %2459 = vmatprep.subr.mxu1 %v4517_v4  ;;  %595 = vmatprep.subr.mxu0 %v2984_v56 }
  0x51   :  { %2460 = vmatpush3.msra.mxu1 %v3255_v35  ;;  %596 = vmatpush1.msra.mxu0 %v2996_v58 }
  0x52   :  { %2461 = vmatprep.subr.mxu1 %v4517_v4  ;;  %597 = vmatprep.subr.mxu0 %v3002_v59 }
  0x53   :  { %2462 = vmatpush3.msra.mxu1 %v3264_v36  ;;  %598 = vmatpush1.msra.mxu0 %v3011_v61 }
  0x54   :  { %2463 = vmatprep.subr.mxu1 %v4517_v4  ;;  %599 = vmatprep.subr.mxu0 %v3018_v62 }
  0x55   :  { %2464 = vmatpush3.msra.mxu1 %v3273_v37  ;;  %600 = vmatpush1.msra.mxu0 %v3030_v0 }
  0x56   :  { %2465 = vmatprep.subr.mxu1 %v4517_v4  ;;  %601 = vmatprep.subr.mxu0 %v3036_v1 }
  0x57   :  { %2466 = vmatpush3.msra.mxu1 %v3282_v38  ;;  %602 = vmatpush1.msra.mxu0 %v3045_v3 }
  0x58   :  { %2467 = vmatprep.subr.mxu1 %v4517_v4  ;;  %603 = vmatprep.subr.mxu0 %v3052_v5 }
  0x59   :  { %2468 = vmatpush3.msra.mxu1 %v3291_v39  ;;  %604 = vmatpush1.msra.mxu0 %v3064_v7 }
  0x5a   :  { %2470 = vmatmul.mubr.f32.vlgmr.msra.gmra.mxu1 %v4517_v4  ;;  %2472 = vmatprep.subr.mxu1 %v4517_v4 }
  0x5b   :  { %2473 = vmatpush3.msra.mxu1 %v3127_v18  ;;  %605 = vmatprep.subr.mxu0 %v3070_v8 }
  0x5c   :  { %2474 = vmatprep.subr.mxu1 %v4517_v4  ;;  %606 = vmatpush1.msra.mxu0 %v3079_v10 }
  0x5d   :  { %2475 = vmatpush3.msra.mxu1 %v3146_v21  ;;  %607 = vmatprep.subr.mxu0 %v3086_v11 }
  0x5e   :  { %2476 = vmatprep.subr.mxu1 %v4517_v4  ;;  %608 = vmatpush1.msra.mxu0 %v3096_v13 }
  0x5f   :  { %2477 = vmatpush3.msra.mxu1 %v3165_v24  ;;  %609 = vmatprep.subr.mxu0 %v3102_v14 }
  0x60   :  { %2478 = vmatprep.subr.mxu1 %v4517_v4  ;;  %610 = vmatpush1.msra.mxu0 %v3108_v15 }
  0x61   :  { %2479 = vmatpush3.msra.mxu1 %v3184_v27  ;;  %611 = vmatprep.subr.mxu0 %v3114_v16 }
  0x62   :  { %2480 = vmatprep.subr.mxu1 %v4517_v4  ;;  %612 = vmatpush1.msra.mxu0 %v3121_v17 }
  0x63   :  { %2481 = vmatpush3.msra.mxu1 %v3193_v28  ;;  %613 = vmatprep.subr.mxu0 %v3133_v19 }
  0x64   :  { %2482 = vmatprep.subr.mxu1 %v4517_v4  ;;  %614 = vmatpush1.msra.mxu0 %v3140_v20 }
  0x65   :  { %2483 = vmatpush3.msra.mxu1 %v3202_v29  ;;  %615 = vmatprep.subr.mxu0 %v3152_v22 }
  0x66   :  { %2484 = vmatprep.subr.mxu1 %v4517_v4  ;;  %616 = vmatpush1.msra.mxu0 %v3159_v23 }
  0x67   :  { %2485 = vmatpush3.msra.mxu1 %v3210_v30  ;;  %617 = vmatprep.subr.mxu0 %v3171_v25 }
  0x68   :  { %2486 = vmatprep.subr.mxu1 %v4517_v4  ;;  %618 = vmatpush1.msra.mxu0 %v3178_v26 }
  0x69   :  { %2487 = vmatpush3.msra.mxu1 %v3219_v31  ;;  %651 = vmatprep.mubr.f32.mxu0 %v4517_v4 }
  0x6a   :  { %2488 = vmatprep.subr.mxu1 %v4517_v4  ;;  %2504 = vmatprep.mubr.msk.f32.mxu1 %vm2737_vm0, %v4517_v4 }
  0x6b   :  { %2489 = vmatpush3.msra.mxu1 %v3228_v32  ;;  %802 = vmatprep.subr.mxu0 %v2924_v45  ;;  %v4526_v45 = vsub.s32 1, %v3352_v41 }
  0x6c   :  { %2490 = vmatprep.subr.mxu1 %v4517_v4 }
  0x6d   :  { %2491 = vmatpush3.msra.mxu1 %v3237_v33  ;;  %v92_v57 = vrot.slane %v83_v43, %v4526_v45  ;;  %v4535_v45 = vsub.s32 2, %v3352_v41 }
  0x6e   :  { %2492 = vmatprep.subr.mxu1 %v4517_v4 }
  0x6f   :  { %2493 = vmatpush3.msra.mxu1 %v3246_v34 }
  0x70   :  { %2494 = vmatprep.subr.mxu1 %v4517_v4 }
  0x71   :  { %2495 = vmatpush3.msra.mxu1 %v3255_v35 }
  0x72   :  { %2496 = vmatprep.subr.mxu1 %v4517_v4 }
  0x73   :  { %2497 = vmatpush3.msra.mxu1 %v3264_v36 }
  0x74   :  { %2498 = vmatprep.subr.mxu1 %v4517_v4 }
  0x75   :  { %2499 = vmatpush3.msra.mxu1 %v3273_v37 }
  0x76   :  { %2500 = vmatprep.subr.mxu1 %v4517_v4 }
  0x77   :  { %2501 = vmatpush3.msra.mxu1 %v3282_v38 }
  0x78   :  { %2502 = vmatprep.subr.mxu1 %v4517_v4 }
  0x79   :  { %2503 = vmatpush3.msra.mxu1 %v3291_v39 }
  0x7a   :  { %2507 = vmatprep.subr.mxu1 %v4517_v4 }
  0xe2   :  { %v166_v44 = vpop.f32.mrf.mxu0 }
  0xe4   :  { %v168_v48 = vpop.f32.mrf.mxu0 }
  0xe5   :  { %v169_v41 = vadd.f32 %v168_v48, %v92_v57 }
  0xe6   :  { %v172_v54 = vpop.f32.mrf.mxu0 }
  0xe7   :  { %v3363_v60 = vadd.f32 %v172_v54, %v88_v51 }
  0xe8   :  { %v174_v63 = vpop.f32.mrf.mxu0 }
  0xe9   :  { %4547 = vst [vmem:[#allocation13_spill] sm:$0xff] %v3363_v60  ;;  %v3365_v2 = vadd.f32 %v174_v63, %v92_v57 }
  0xea   :  { %v178_v6 = vpop.f32.mrf.mxu0 }
  0xeb   :  { %4548 = vst [vmem:[#allocation14_spill] sm:$0xff] %v3365_v2  ;;  %v3367_v9 = vadd.f32 %v178_v6, %v88_v51  ;;  %v96_v6 = vrot.slane %v83_v43, %v4535_v45 }
  0xec   :  { %v180_v12 = vpop.f32.mrf.mxu0 }
  0xed   :  { %4549 = vst [vmem:[#allocation15_spill] sm:$0xff] %v3367_v9  ;;  %v3369_v40 = vadd.f32 %v180_v12, %v92_v57 }
  0xee   :  { %v184_v4 = vpop.f32.mrf.mxu0 }
  0xef   :  { %4550 = vst [vmem:[#allocation16_spill] sm:$0xff] %v3369_v40  ;;  %v3371_v39 = vadd.f32 %v184_v4, %v88_v51 }
  0xf0   :  { %v186_v26 = vpop.f32.mrf.mxu0 }
  0xf1   :  { %4551 = vst [vmem:[#allocation17_spill] sm:$0xff] %v3371_v39  ;;  %v3373_v42 = vadd.f32 %v186_v26, %v92_v57 }
  0xf2   :  { %v190_v25 = vpop.f32.mrf.mxu0 }
  0xf3   :  { %4552 = vst [vmem:[#allocation18_spill] sm:$0xff] %v3373_v42  ;;  %v3376_v54 = vadd.f32 %v190_v25, %v88_v51  ;;  %v167_v42 = vadd.f32 %v166_v44, %v88_v51 }
  0xf4   :  { %v192_v60 = vpop.f32.mrf.mxu0 }
  0xf5   :  { %4553 = vst [vmem:[#allocation19_spill] sm:$0xff] %v3376_v54  ;;  %v3378_v63 = vadd.f32 %v192_v60, %v92_v57 }
  0xf6   :  { %v196_v2 = vpop.f32.mrf.mxu0 }
  0xf7   :  { %4554 = vst [vmem:[#allocation20_spill] sm:$0xff] %v3378_v63  ;;  %v3382_v12 = vadd.f32 %v196_v2, %v88_v51 }
  0xf8   :  { %v198_v40 = vpop.f32.mrf.mxu0 }
  0xf9   :  { %4555 = vst [vmem:[#allocation21_spill] sm:$0xff] %v3382_v12  ;;  %v3384_v4 = vadd.f32 %v198_v40, %v92_v57  ;;  %v2430_v39 = vpop.f32.mrf.mxu1 }
  0xfa   :  { %v3386_v26 = vadd.f32 %v2430_v39, %v96_v6 }
  0xfb   :  { %4556 = vst [vmem:[#allocation22_spill] sm:$0xff] %v3384_v4  ;;  %v267_v38 = vpop.f32.mrf.mxu1 }
  0xfc   :  { %v268_v57 = vadd.f32 %v267_v38, %v96_v6  ;;  %v4559_v38 = vmov 0.0  }
 0x102   :  { %v432_v9 = vpop.f32.mrf.mxu0 }
 0x103   :  { %v507_v25 = vadd.f32 %v432_v9, %v167_v42 }
 0x104   :  { %v2433_v54 = vpop.f32.mrf.mxu1  ;;  %v434_v63 = vpop.f32.mrf.mxu0 }
 0x105   :  { %v2259_v23 = vmul.f32 -1.442695, %v507_v25  ;;  %v3388_v60 = vadd.f32 %v2433_v54, %v96_v6  ;;  %v514_v40 = vadd.f32 %v434_v63, %v169_v41 }
 0x106   :  { %v277_v22 = vpop.f32.mrf.mxu1 }
 0x107   :  { %2652 = vpow2.f32 %v2259_v23  ;;  %v3390_v43 = vadd.f32 %v277_v22, %v96_v6  ;;  %v2260_v44 = vmul.f32 -1.442695, %v514_v40  ;;  %v3399_v22 = vld [vmem:[%s4512_s4] ss:$0 sm:$0xff] }
 0x108   :  { %v2436_v2 = vpop.f32.mrf.mxu1 }
 0x109   :  { %v3392_v45 = vadd.f32 %v2436_v2, %v96_v6  ;;  %2654 = vpow2.f32 %v2260_v44 }
 0x10a   :  { %v287_v39 = vpop.f32.mrf.mxu1 }
 0x10b   :  { %4557 = vst [vmem:[#allocation23_spill] sm:$0xff] %v3392_v45  ;;  %v3394_v4 = vadd.f32 %v287_v39, %v96_v6 }
 0x10d   :  { %4558 = vst [vmem:[#allocation24_spill] sm:$0xff] %v3394_v4 }
 0x114   :  { %v2653_v42 = vpop.eup %2652 }
 0x115   :  { %v511_v51 = vadd.f32 1.0, %v2653_v42 }
 0x116   :  { %v2655_v25 = vpop.eup %2654 }
 0x117   :  { %2656 = vrcp.f32 %v511_v51  ;;  %v518_v23 = vadd.f32 1.0, %v2655_v25 }
 0x119   :  { %2658 = vrcp.f32 %v518_v23 }
 0x11a   :  { %v503_v9 = vpop.f32.mrf.mxu1 }
 0x11b   :  { %v527_v41 = vadd.f32 %v3399_v22, %v503_v9 }
 0x11c   :  { %v2471_v54 = vpop.f32.mrf.mxu1 }
 0x124   :  { %v2657_v48 = vpop.eup %2656 }
 0x125   :  { %v528_v63 = vmul.f32 %v2657_v48, %v527_v41 }
 0x126   :  { %v2659_v40 = vpop.eup %2658 }
 0x127   :  { %v529_v2 = vadd.f32 %v528_v63, %v268_v57  ;;  %v531_v39 = vsub.f32 1.0, %v2659_v40  ;;  %v533_v51 = vmul.f32 0.0, %v2659_v40  ;;  %v3617_v40 = vld [vmem:[%s4510_s2 + $0xc0] sm:$0xff] }
 0x129   :  { %2660 = vtanh.f32 %v529_v2 }
 0x136   :  { %v2661_v44 = vpop.eup %2660 }
 0x137   :  { %v532_v42 = vmul.f32 %v2661_v44, %v531_v39  ;;  %v3622_v39 = vld [vmem:[%s4510_s2 + $0xb0] sm:$0xff]  ;;  %v3627_v44 = vld [vmem:[%s4510_s2 + $0xa8] sm:$0xff] }
 0x139   :  { %v3402_v54 = vadd.f32 %v533_v51, %v532_v42  ;;  %v3633_v42 = vld [vmem:[%s4510_s2 + $0x98] sm:$0xff]  ;;  %v3639_v51 = vld [vmem:[%s4510_s2 + $0x90] sm:$0xff] }
 0x13b   :  { %535 = vst [vmem:[%s4515_s7] sm:$0xff] %v3402_v54  ;;  %652 = vmatmul.mubr.f32.vlgmr.msra.gmra.mxu0 %v3402_v54  ;;  %2505 = vmatmul.mubr.f32.vlgmr.msra.gmra.mxu1 %v3402_v54 }
 0x13c   :  { %803 = vmatpush1.msra.mxu0 %v2929_v46  ;;  %2508 = vmatpush3.msra.mxu1 %v3127_v18  ;;  %v4560_v46 = vld [vmem:[#allocation6_spill] sm:$0xff] }
 0x13d   :  { %804 = vmatprep.subr.mxu0 %v2934_v47  ;;  %2509 = vmatprep.subr.mxu1 %v4559_v38  ;;  %v4561_v47 = vld [vmem:[#allocation7_spill] sm:$0xff] }
 0x13e   :  { %805 = vmatpush1.msra.mxu0 %v2944_v49  ;;  %2510 = vmatpush3.msra.mxu1 %v3146_v21  ;;  %v4562_v49 = vld [vmem:[#allocation10_spill] sm:$0xff] }
 0x13f   :  { %806 = vmatprep.subr.mxu0 %v2950_v50  ;;  %2511 = vmatprep.subr.mxu1 %v4559_v38  ;;  %v4563_v50 = vld [vmem:[#allocation8_spill] sm:$0xff] }
 0x140   :  { %807 = vmatpush1.msra.mxu0 %v2962_v52  ;;  %2512 = vmatpush3.msra.mxu1 %v3165_v24  ;;  %v4564_v52 = vld [vmem:[#allocation9_spill] sm:$0xff] }
 0x141   :  { %808 = vmatprep.subr.mxu0 %v2968_v53  ;;  %2513 = vmatprep.subr.mxu1 %v4559_v38  ;;  %v4565_v53 = vld [vmem:[#allocation11_spill] sm:$0xff] }
 0x142   :  { %809 = vmatpush1.msra.mxu0 %v2977_v55  ;;  %2514 = vmatpush3.msra.mxu1 %v3184_v27 }
 0x143   :  { %810 = vmatprep.subr.mxu0 %v2984_v56  ;;  %2515 = vmatprep.subr.mxu1 %v4559_v38 }
 0x144   :  { %811 = vmatpush1.msra.mxu0 %v2996_v58  ;;  %2516 = vmatpush3.msra.mxu1 %v3193_v28  ;;  %v4566_v58 = vld [vmem:[#allocation13_spill] sm:$0xff] }
 0x145   :  { %812 = vmatprep.subr.mxu0 %v3002_v59  ;;  %2517 = vmatprep.subr.mxu1 %v4559_v38 }
 0x146   :  { %813 = vmatpush1.msra.mxu0 %v3011_v61  ;;  %2518 = vmatpush3.msra.mxu1 %v3202_v29 }
 0x147   :  { %814 = vmatprep.subr.mxu0 %v3018_v62  ;;  %2519 = vmatprep.subr.mxu1 %v4559_v38 }
 0x148   :  { %815 = vmatpush1.msra.mxu0 %v3030_v0  ;;  %2520 = vmatpush3.msra.mxu1 %v3210_v30 }
 0x149   :  { %816 = vmatprep.subr.mxu0 %v3036_v1  ;;  %2521 = vmatprep.subr.mxu1 %v4559_v38  ;;  %v4567_v1 = vld [vmem:[#allocation14_spill] sm:$0xff] }
 0x14a   :  { %817 = vmatpush1.msra.mxu0 %v3045_v3  ;;  %2522 = vmatpush3.msra.mxu1 %v3219_v31 }
 0x14b   :  { %818 = vmatprep.subr.mxu0 %v3052_v5  ;;  %2523 = vmatprep.subr.mxu1 %v4559_v38 }
 0x14c   :  { %819 = vmatpush1.msra.mxu0 %v3064_v7  ;;  %2524 = vmatpush3.msra.mxu1 %v3228_v32 }
 0x14d   :  { %820 = vmatprep.subr.mxu0 %v3070_v8  ;;  %2525 = vmatprep.subr.mxu1 %v4559_v38 }
 0x14e   :  { %821 = vmatpush1.msra.mxu0 %v3079_v10  ;;  %2526 = vmatpush3.msra.mxu1 %v3237_v33 }
 0x14f   :  { %822 = vmatprep.subr.mxu0 %v3086_v11  ;;  %2527 = vmatprep.subr.mxu1 %v4559_v38 }
 0x150   :  { %823 = vmatpush1.msra.mxu0 %v3096_v13  ;;  %2528 = vmatpush3.msra.mxu1 %v3246_v34 }
 0x151   :  { %824 = vmatprep.subr.mxu0 %v3102_v14  ;;  %2529 = vmatprep.subr.mxu1 %v4559_v38 }
 0x152   :  { %825 = vmatpush1.msra.mxu0 %v3108_v15  ;;  %2530 = vmatpush3.msra.mxu1 %v3255_v35 }
 0x153   :  { %826 = vmatprep.subr.mxu0 %v3114_v16  ;;  %2531 = vmatprep.subr.mxu1 %v4559_v38 }
 0x154   :  { %827 = vmatpush1.msra.mxu0 %v3121_v17  ;;  %2532 = vmatpush3.msra.mxu1 %v3264_v36 }
 0x155   :  { %828 = vmatprep.subr.mxu0 %v3133_v19  ;;  %2533 = vmatprep.subr.mxu1 %v4559_v38 }
 0x156   :  { %829 = vmatpush1.msra.mxu0 %v3140_v20  ;;  %2534 = vmatpush3.msra.mxu1 %v3273_v37 }
 0x157   :  { %830 = vmatprep.subr.mxu0 %v4560_v46  ;;  %2535 = vmatprep.subr.mxu1 %v4559_v38 }
 0x158   :  { %831 = vmatpush1.msra.mxu0 %v4561_v47  ;;  %2536 = vmatpush3.msra.mxu1 %v4562_v49 }
 0x159   :  { %832 = vmatprep.subr.mxu0 %v4563_v50  ;;  %2537 = vmatprep.subr.mxu1 %v4559_v38 }
 0x15a   :  { %833 = vmatpush1.msra.mxu0 %v4564_v52  ;;  %866 = vmatprep.mubr.f32.mxu0 %v4559_v38 }
 0x15b   :  { %2538 = vmatpush3.msra.mxu1 %v4565_v53  ;;  %2539 = vmatprep.mubr.msk.f32.mxu1 %vm2737_vm0, %v4559_v38 }
 0x15c   :  { %2542 = vmatprep.subr.mxu1 %v4559_v38 }
 0x1fb   :  { %v653_v55 = vpop.f32.mrf.mxu0  ;;  %v724_v56 = vpop.f32.mrf.mxu1 }
 0x1fc   :  { %v728_v59 = vadd.f32 %v653_v55, %v4566_v58  ;;  %v742_v13 = vadd.f32 %v3399_v22, %v724_v56 }
 0x1fd   :  { %v2506_v61 = vpop.f32.mrf.mxu1  ;;  %v655_v0 = vpop.f32.mrf.mxu0 }
 0x1fe   :  { %v2262_v62 = vmul.f32 -1.442695, %v728_v59  ;;  %v735_v3 = vadd.f32 %v655_v0, %v4567_v1 }
 0x200   :  { %2662 = vpow2.f32 %v2262_v62  ;;  %v2263_v5 = vmul.f32 -1.442695, %v735_v3 }
 0x202   :  { %2664 = vpow2.f32 %v2263_v5 }
 0x20d   :  { %v2663_v7 = vpop.eup %2662 }
 0x20e   :  { %v732_v8 = vadd.f32 1.0, %v2663_v7 }
 0x20f   :  { %v2665_v10 = vpop.eup %2664 }
 0x210   :  { %2666 = vrcp.f32 %v732_v8  ;;  %v739_v11 = vadd.f32 1.0, %v2665_v10 }
 0x212   :  { %2668 = vrcp.f32 %v739_v11  ;;  %v3714_v11 = vld [vmem:[%s4510_s2 + $0x160] sm:$0xff] }
 0x21d   :  { %v2667_v6 = vpop.eup %2666 }
 0x21e   :  { %v743_v9 = vmul.f32 %v2667_v6, %v742_v13  ;;  %v3721_v13 = vld [vmem:[%s4510_s2 + $0x148] sm:$0xff]  ;;  %v3728_v6 = vld [vmem:[%s4510_s2 + $0x130] sm:$0xff] }
 0x21f   :  { %v2669_v23 = vpop.eup %2668 }
 0x220   :  { %v744_v25 = vadd.f32 %v743_v9, %v3386_v26  ;;  %v746_v41 = vsub.f32 1.0, %v2669_v23  ;;  %v748_v63 = vmul.f32 %v2669_v23, %v3402_v54  ;;  %v3611_v26 = vld [vmem:[%s4510_s2 + $0xc8] sm:$0xff]  ;;  %v3645_v54 = vld [vmem:[%s4510_s2 + $0x80] sm:$0xff]  ;;  %v3735_v9 = vld [vmem:[%s4510_s2 + $0x118] sm:$0xff] }
 0x221   :  { %v3749_v23 = vld [vmem:[%s4510_s2 + $0xe8] sm:$0xff] }
 0x222   :  { %2670 = vtanh.f32 %v744_v25  ;;  %v3742_v25 = vld [vmem:[%s4510_s2 + $0x100] sm:$0xff] }
 0x22f   :  { %v2671_v48 = vpop.eup %2670 }
 0x230   :  { %v747_v57 = vmul.f32 %v2671_v48, %v746_v41  ;;  %v3756_v41 = vld [vmem:[%s4510_s2 + $0xd0] sm:$0xff]  ;;  %v3761_v48 = vld [vmem:[%s4510_s2 + $0xb8] sm:$0xff] }
 0x232   :  { %v3481_v2 = vadd.f32 %v748_v63, %v747_v57  ;;  %v3767_v57 = vld [vmem:[%s4510_s2 + $0x68] sm:$0xff]  ;;  %v3772_v63 = vld [vmem:[%s4510_s2 + $0x60] sm:$0xff] }
 0x234   :  { %750 = vst [vmem:[%s4515_s7 + $0x8] sm:$0xff] %v3481_v2  ;;  %867 = vmatmul.mubr.f32.vlgmr.msra.gmra.mxu0 %v3481_v2  ;;  %2540 = vmatmul.mubr.f32.vlgmr.msra.gmra.mxu1 %v3481_v2 }
 0x235   :  { %2543 = vmatpush3.msra.mxu1 %v3127_v18  ;;  %1081 = vmatprep.mubr.f32.mxu0 %v4559_v38  ;;  %v3527_v18 = vld [vmem:[%s4510_s2 + $0x170] sm:$0xff] }
 0x236   :  { %2544 = vmatprep.subr.mxu1 %v4559_v38  ;;  %2574 = vmatprep.mubr.msk.f32.mxu1 %vm2737_vm0, %v4559_v38 }
 0x237   :  { %2545 = vmatpush3.msra.mxu1 %v3146_v21  ;;  %1017 = vmatprep.subr.mxu0 %v3527_v18  ;;  %v3533_v21 = vld [vmem:[%s4510_s2 + $0x168] sm:$0xff] }
 0x238   :  { %2546 = vmatprep.subr.mxu1 %v4559_v38  ;;  %1018 = vmatpush1.msra.mxu0 %v3533_v21 }
 0x239   :  { %2547 = vmatpush3.msra.mxu1 %v3165_v24  ;;  %v3539_v24 = vld [vmem:[%s4510_s2 + $0x158] sm:$0xff] }
 0x23a   :  { %2548 = vmatprep.subr.mxu1 %v4559_v38  ;;  %1019 = vmatprep.subr.mxu0 %v3539_v24 }
 0x23b   :  { %2549 = vmatpush3.msra.mxu1 %v3184_v27  ;;  %v3545_v27 = vld [vmem:[%s4510_s2 + $0x150] sm:$0xff] }
 0x23c   :  { %2550 = vmatprep.subr.mxu1 %v4559_v38  ;;  %1020 = vmatpush1.msra.mxu0 %v3545_v27 }
 0x23d   :  { %2551 = vmatpush3.msra.mxu1 %v3193_v28  ;;  %v3551_v28 = vld [vmem:[%s4510_s2 + $0x140] sm:$0xff] }
 0x23e   :  { %2552 = vmatprep.subr.mxu1 %v4559_v38  ;;  %1021 = vmatprep.subr.mxu0 %v3551_v28 }
 0x23f   :  { %2553 = vmatpush3.msra.mxu1 %v3202_v29  ;;  %v3557_v29 = vld [vmem:[%s4510_s2 + $0x138] sm:$0xff] }
 0x240   :  { %2554 = vmatprep.subr.mxu1 %v4559_v38  ;;  %1022 = vmatpush1.msra.mxu0 %v3557_v29 }
 0x241   :  { %2555 = vmatpush3.msra.mxu1 %v3210_v30  ;;  %v3563_v30 = vld [vmem:[%s4510_s2 + $0x128] sm:$0xff] }
 0x242   :  { %2556 = vmatprep.subr.mxu1 %v4559_v38  ;;  %1023 = vmatprep.subr.mxu0 %v3563_v30 }
 0x243   :  { %2557 = vmatpush3.msra.mxu1 %v3219_v31  ;;  %v3569_v31 = vld [vmem:[%s4510_s2 + $0x120] sm:$0xff] }
 0x244   :  { %2558 = vmatprep.subr.mxu1 %v4559_v38  ;;  %1024 = vmatpush1.msra.mxu0 %v3569_v31 }
 0x245   :  { %2559 = vmatpush3.msra.mxu1 %v3228_v32  ;;  %v3575_v32 = vld [vmem:[%s4510_s2 + $0x110] sm:$0xff] }
 0x246   :  { %2560 = vmatprep.subr.mxu1 %v4559_v38  ;;  %1025 = vmatprep.subr.mxu0 %v3575_v32 }
 0x247   :  { %2561 = vmatpush3.msra.mxu1 %v3237_v33  ;;  %v3581_v33 = vld [vmem:[%s4510_s2 + $0x108] sm:$0xff] }
 0x248   :  { %2562 = vmatprep.subr.mxu1 %v4559_v38  ;;  %1026 = vmatpush1.msra.mxu0 %v3581_v33 }
 0x249   :  { %2563 = vmatpush3.msra.mxu1 %v3246_v34  ;;  %v3587_v34 = vld [vmem:[%s4510_s2 + $0xf8] sm:$0xff] }
 0x24a   :  { %2564 = vmatprep.subr.mxu1 %v4559_v38  ;;  %1027 = vmatprep.subr.mxu0 %v3587_v34 }
 0x24b   :  { %2565 = vmatpush3.msra.mxu1 %v3255_v35  ;;  %v3593_v35 = vld [vmem:[%s4510_s2 + $0xf0] sm:$0xff] }
 0x24c   :  { %2566 = vmatprep.subr.mxu1 %v4559_v38  ;;  %1028 = vmatpush1.msra.mxu0 %v3593_v35 }
 0x24d   :  { %2567 = vmatpush3.msra.mxu1 %v3264_v36  ;;  %v3599_v36 = vld [vmem:[%s4510_s2 + $0xe0] sm:$0xff] }
 0x24e   :  { %2568 = vmatprep.subr.mxu1 %v4559_v38  ;;  %1029 = vmatprep.subr.mxu0 %v3599_v36 }
 0x24f   :  { %2569 = vmatpush3.msra.mxu1 %v3273_v37  ;;  %v3605_v37 = vld [vmem:[%s4510_s2 + $0xd8] sm:$0xff] }
 0x250   :  { %2570 = vmatprep.subr.mxu1 %v4559_v38  ;;  %1030 = vmatpush1.msra.mxu0 %v3605_v37 }
 0x251   :  { %2571 = vmatpush3.msra.mxu1 %v4562_v49  ;;  %1031 = vmatprep.subr.mxu0 %v3611_v26  ;;  %v3651_v49 = vld [vmem:[%s4510_s2 + $0x78] sm:$0xff] }
 0x252   :  { %2572 = vmatprep.subr.mxu1 %v4559_v38  ;;  %1032 = vmatpush1.msra.mxu0 %v3617_v40 }
 0x253   :  { %2573 = vmatpush3.msra.mxu1 %v4565_v53  ;;  %1033 = vmatprep.subr.mxu0 %v3622_v39  ;;  %v4568_v53 = vld [vmem:[#allocation15_spill] sm:$0xff] }
 0x254   :  { %2577 = vmatprep.subr.mxu1 %v4559_v38  ;;  %1034 = vmatpush1.msra.mxu0 %v3627_v44 }
 0x255   :  { %1035 = vmatprep.subr.mxu0 %v3633_v42 }
 0x256   :  { %1036 = vmatpush1.msra.mxu0 %v3639_v51 }
 0x257   :  { %1037 = vmatprep.subr.mxu0 %v3645_v54 }
 0x258   :  { %1038 = vmatpush1.msra.mxu0 %v3651_v49 }
 0x259   :  { %1039 = vmatprep.subr.mxu0 %v3102_v14 }
 0x25a   :  { %1040 = vmatpush1.msra.mxu0 %v3108_v15 }
 0x25b   :  { %1041 = vmatprep.subr.mxu0 %v3114_v16 }
 0x25c   :  { %1042 = vmatpush1.msra.mxu0 %v3121_v17 }
 0x25d   :  { %1043 = vmatprep.subr.mxu0 %v3133_v19  ;;  %v4569_v19 = vld [vmem:[#allocation16_spill] sm:$0xff] }
 0x25e   :  { %1044 = vmatpush1.msra.mxu0 %v3140_v20 }
 0x25f   :  { %1045 = vmatprep.subr.mxu0 %v4560_v46 }
 0x260   :  { %1046 = vmatpush1.msra.mxu0 %v4561_v47 }
 0x261   :  { %1047 = vmatprep.subr.mxu0 %v4563_v50 }
 0x262   :  { %1048 = vmatpush1.msra.mxu0 %v4564_v52 }
 0x263   :  { %1232 = vmatprep.subr.mxu0 %v3527_v18 }
 0x2f4   :  { %v868_v14 = vpop.f32.mrf.mxu0  ;;  %v939_v15 = vpop.f32.mrf.mxu1 }
 0x2f5   :  { %v943_v16 = vadd.f32 %v868_v14, %v4568_v53  ;;  %v957_v52 = vadd.f32 %v3399_v22, %v939_v15  ;;  %v3784_v14 = vld [vmem:[%s4510_s2 + $0x50] sm:$0xff]  ;;  %v3789_v15 = vld [vmem:[%s4510_s2 + $0x48] sm:$0xff]  ;;  %v3796_v53 = vld [vmem:[%s4510_s2 + $0x38] sm:$0xff] }
 0x2f6   :  { %v2541_v55 = vpop.f32.mrf.mxu1  ;;  %v870_v56 = vpop.f32.mrf.mxu0 }
 0x2f7   :  { %v2264_v17 = vmul.f32 -1.442695, %v943_v16  ;;  %v950_v20 = vadd.f32 %v870_v56, %v4569_v19  ;;  %v3802_v16 = vld [vmem:[%s4510_s2 + $0x88] sm:$0xff]  ;;  %v3808_v55 = vld [vmem:[%s4510_s2 + $0x30] sm:$0xff]  ;;  %v3827_v19 = vld [vmem:[%s4510_s2 + $0x18] sm:$0xff] }
 0x2f8   :  { %v3821_v56 = vld [vmem:[%s4510_s2 + $0x70] sm:$0xff] }
 0x2f9   :  { %2672 = vpow2.f32 %v2264_v17  ;;  %v2265_v58 = vmul.f32 -1.442695, %v950_v20  ;;  %v3815_v17 = vld [vmem:[%s4510_s2 + $0x20] sm:$0xff]  ;;  %v3834_v20 = vld [vmem:[%s4510_s2 + $0x8] sm:$0xff] }
 0x2fa   :  { %4570 = vst [vmem:[#allocation6_spill] sm:$0xff] %v3834_v20 }
 0x2fb   :  { %2674 = vpow2.f32 %v2265_v58  ;;  %v3840_v58 = vld [vmem:[%s4510_s2 + $0x58] sm:$0xff] }
 0x306   :  { %v2673_v46 = vpop.eup %2672 }
 0x307   :  { %v947_v47 = vadd.f32 1.0, %v2673_v46  ;;  %v3846_v46 = vld [vmem:[%s4510_s2] sm:$0xff] }
 0x308   :  { %v2675_v50 = vpop.eup %2674  ;;  %4571 = vst [vmem:[#allocation7_spill] sm:$0xff] %v3846_v46 }
 0x309   :  { %2676 = vrcp.f32 %v947_v47  ;;  %v954_v59 = vadd.f32 1.0, %v2675_v50  ;;  %v3854_v47 = vld [vmem:[%s4510_s2 + $0x40] sm:$0xff]  ;;  %v3863_v50 = vld [vmem:[%s4510_s2 + $0x28] sm:$0xff] }
 0x30a   :  { %4572 = vst [vmem:[#allocation10_spill] sm:$0xff] %v3863_v50 }
 0x30b   :  { %2678 = vrcp.f32 %v954_v59  ;;  %v3871_v59 = vld [vmem:[%s4510_s2 + $0x10] sm:$0xff] }
 0x30c   :  { %4573 = vst [vmem:[#allocation8_spill] sm:$0xff] %v3871_v59 }
 0x316   :  { %v2677_v61 = vpop.eup %2676 }
 0x317   :  { %v958_v62 = vmul.f32 %v2677_v61, %v957_v52 }
 0x318   :  { %v2679_v1 = vpop.eup %2678 }
 0x319   :  { %v959_v0 = vadd.f32 %v958_v62, %v3390_v43  ;;  %v961_v3 = vsub.f32 1.0, %v2679_v1  ;;  %v963_v8 = vmul.f32 %v2679_v1, %v3481_v2  ;;  %v3707_v43 = vld [vmem:[%s4510_s2 + $0x178] sm:$0xff]  ;;  %v3778_v2 = vld [vmem:[%s4510_s2 + $0xa0] sm:$0xff] }
 0x31b   :  { %2680 = vtanh.f32 %v959_v0 }
 0x328   :  { %v2681_v5 = vpop.eup %2680 }
 0x329   :  { %v962_v7 = vmul.f32 %v2681_v5, %v961_v3  ;;  %v4575_v5 = vld [vmem:[#allocation18_spill] sm:$0xff] }
 0x32b   :  { %v3672_v10 = vadd.f32 %v963_v8, %v962_v7 }
 0x32d   :  { %965 = vst [vmem:[%s4515_s7 + $0x10] sm:$0xff] %v3672_v10  ;;  %1082 = vmatmul.mubr.f32.vlgmr.msra.gmra.mxu0 %v3672_v10  ;;  %2575 = vmatmul.mubr.f32.vlgmr.msra.gmra.mxu1 %v3672_v10 }
 0x32e   :  { %1233 = vmatpush1.msra.mxu0 %v3533_v21  ;;  %1296 = vmatprep.mubr.f32.mxu0 %v4559_v38 }
 0x32f   :  { %1234 = vmatprep.subr.mxu0 %v3539_v24  ;;  %2609 = vmatprep.mubr.msk.f32.mxu1 %vm2737_vm0, %v4559_v38 }
 0x330   :  { %1235 = vmatpush1.msra.mxu0 %v3545_v27  ;;  %2578 = vmatpush3.msra.mxu1 %v3707_v43 }
 0x331   :  { %1236 = vmatprep.subr.mxu0 %v3551_v28  ;;  %2579 = vmatprep.subr.mxu1 %v4559_v38 }
 0x332   :  { %1237 = vmatpush1.msra.mxu0 %v3557_v29  ;;  %2580 = vmatpush3.msra.mxu1 %v3714_v11 }
 0x333   :  { %1238 = vmatprep.subr.mxu0 %v3563_v30  ;;  %2581 = vmatprep.subr.mxu1 %v4559_v38 }
 0x334   :  { %1239 = vmatpush1.msra.mxu0 %v3569_v31  ;;  %2582 = vmatpush3.msra.mxu1 %v3721_v13 }
 0x335   :  { %1240 = vmatprep.subr.mxu0 %v3575_v32  ;;  %2583 = vmatprep.subr.mxu1 %v4559_v38 }
 0x336   :  { %1241 = vmatpush1.msra.mxu0 %v3581_v33  ;;  %2584 = vmatpush3.msra.mxu1 %v3728_v6 }
 0x337   :  { %1242 = vmatprep.subr.mxu0 %v3587_v34  ;;  %2585 = vmatprep.subr.mxu1 %v4559_v38 }
 0x338   :  { %1243 = vmatpush1.msra.mxu0 %v3593_v35  ;;  %2586 = vmatpush3.msra.mxu1 %v3735_v9 }
 0x339   :  { %1244 = vmatprep.subr.mxu0 %v3599_v36  ;;  %2587 = vmatprep.subr.mxu1 %v4559_v38 }
 0x33a   :  { %1245 = vmatpush1.msra.mxu0 %v3605_v37  ;;  %2588 = vmatpush3.msra.mxu1 %v3742_v25 }
 0x33b   :  { %1246 = vmatprep.subr.mxu0 %v3611_v26  ;;  %2589 = vmatprep.subr.mxu1 %v4559_v38 }
 0x33c   :  { %1247 = vmatpush1.msra.mxu0 %v3617_v40  ;;  %2590 = vmatpush3.msra.mxu1 %v3749_v23 }
 0x33d   :  { %1248 = vmatprep.subr.mxu0 %v3622_v39  ;;  %2591 = vmatprep.subr.mxu1 %v4559_v38 }
 0x33e   :  { %1249 = vmatpush1.msra.mxu0 %v3627_v44  ;;  %2592 = vmatpush3.msra.mxu1 %v3756_v41 }
 0x33f   :  { %1250 = vmatprep.subr.mxu0 %v3633_v42  ;;  %2593 = vmatprep.subr.mxu1 %v4559_v38 }
 0x340   :  { %1251 = vmatpush1.msra.mxu0 %v3639_v51  ;;  %2594 = vmatpush3.msra.mxu1 %v3761_v48 }
 0x341   :  { %1252 = vmatprep.subr.mxu0 %v3645_v54  ;;  %2595 = vmatprep.subr.mxu1 %v4559_v38 }
 0x342   :  { %1253 = vmatpush1.msra.mxu0 %v3651_v49  ;;  %2596 = vmatpush3.msra.mxu1 %v3778_v2 }
 0x343   :  { %1254 = vmatprep.subr.mxu0 %v3767_v57  ;;  %2597 = vmatprep.subr.mxu1 %v4559_v38 }
 0x344   :  { %1255 = vmatpush1.msra.mxu0 %v3772_v63  ;;  %2598 = vmatpush3.msra.mxu1 %v3802_v16 }
 0x345   :  { %1256 = vmatprep.subr.mxu0 %v3784_v14  ;;  %2599 = vmatprep.subr.mxu1 %v4559_v38 }
 0x346   :  { %1257 = vmatpush1.msra.mxu0 %v3789_v15  ;;  %2600 = vmatpush3.msra.mxu1 %v3821_v56 }
 0x347   :  { %1258 = vmatprep.subr.mxu0 %v3796_v53  ;;  %2601 = vmatprep.subr.mxu1 %v4559_v38 }
 0x348   :  { %1259 = vmatpush1.msra.mxu0 %v3808_v55  ;;  %2602 = vmatpush3.msra.mxu1 %v3840_v58 }
 0x349   :  { %1260 = vmatprep.subr.mxu0 %v3815_v17  ;;  %2603 = vmatprep.subr.mxu1 %v4559_v38 }
 0x34a   :  { %1261 = vmatpush1.msra.mxu0 %v3827_v19  ;;  %2604 = vmatpush3.msra.mxu1 %v3854_v47 }
 0x34b   :  { %1262 = vmatprep.subr.mxu0 %v3834_v20  ;;  %2605 = vmatprep.subr.mxu1 %v4559_v38 }
 0x34c   :  { %1263 = vmatpush1.msra.mxu0 %v3846_v46  ;;  %2606 = vmatpush3.msra.mxu1 %v3863_v50 }
 0x34d   :  { %1447 = vmatprep.subr.mxu0 %v3527_v18  ;;  %2607 = vmatprep.subr.mxu1 %v4559_v38  ;;  %v4574_v18 = vld [vmem:[#allocation17_spill] sm:$0xff] }
 0x34e   :  { %2608 = vmatpush3.msra.mxu1 %v3871_v59 }
 0x34f   :  { %2612 = vmatprep.subr.mxu1 %v4559_v38 }
 0x3ed   :  { %v1083_v52 = vpop.f32.mrf.mxu0  ;;  %v1154_v61 = vpop.f32.mrf.mxu1 }
 0x3ee   :  { %v1158_v62 = vadd.f32 %v1083_v52, %v4574_v18  ;;  %v1172_v59 = vadd.f32 %v3399_v22, %v1154_v61  ;;  %v1699_v61 = vld [vmem:[%s4513_s5 + $0x290] sm:$0xff] }
 0x3ef   :  { %v2576_v0 = vpop.f32.mrf.mxu1  ;;  %v1085_v3 = vpop.f32.mrf.mxu0 }
 0x3f0   :  { %v2266_v1 = vmul.f32 -1.442695, %v1158_v62  ;;  %v1165_v7 = vadd.f32 %v1085_v3, %v4575_v5 }
 0x3f2   :  { %2682 = vpow2.f32 %v2266_v1  ;;  %v2267_v8 = vmul.f32 -1.442695, %v1165_v7  ;;  %v1690_v7 = vld [vmem:[%s4513_s5 + $0x248] sm:$0xff] }
 0x3f4   :  { %2684 = vpow2.f32 %v2267_v8  ;;  %v1692_v8 = vld [vmem:[%s4513_s5 + $0x258] sm:$0xff] }
 0x3ff   :  { %v2683_v45 = vpop.eup %2682 }
 0x400   :  { %v1162_v12 = vadd.f32 1.0, %v2683_v45  ;;  %v4576_v45 = vld [vmem:[#allocation10_spill] sm:$0xff] }
 0x401   :  { %v2685_v4 = vpop.eup %2684 }
 0x402   :  { %2686 = vrcp.f32 %v1162_v12  ;;  %v1169_v46 = vadd.f32 1.0, %v2685_v4  ;;  %v4577_v12 = vld [vmem:[#allocation6_spill] sm:$0xff]  ;;  %v4578_v4 = vld [vmem:[#allocation7_spill] sm:$0xff] }
 0x404   :  { %2688 = vrcp.f32 %v1169_v46  ;;  %v1707_v46 = vld [vmem:[%s4513_s5 + $0x2d0] sm:$0xff] }
 0x40f   :  { %v2687_v20 = vpop.eup %2686 }
 0x410   :  { %v1173_v50 = vmul.f32 %v2687_v20, %v1172_v59  ;;  %v1708_v20 = vld [vmem:[%s4513_s5 + $0x2d8] sm:$0xff]  ;;  %v1697_v59 = vld [vmem:[%s4513_s5 + $0x280] sm:$0xff] }
 0x411   :  { %v2689_v18 = vpop.eup %2688 }
 0x412   :  { %v1174_v52 = vadd.f32 %v1173_v50, %v3388_v60  ;;  %v1176_v62 = vsub.f32 1.0, %v2689_v18  ;;  %v1178_v3 = vmul.f32 %v2689_v18, %v3672_v10  ;;  %v4579_v60 = vld [vmem:[#allocation8_spill] sm:$0xff]  ;;  %v1700_v50 = vld [vmem:[%s4513_s5 + $0x298] sm:$0xff] }
 0x413   :  { %v1691_v18 = vld [vmem:[%s4513_s5 + $0x250] sm:$0xff] }
 0x414   :  { %2690 = vtanh.f32 %v1174_v52  ;;  %v1689_v52 = vld [vmem:[%s4513_s5 + $0x240] sm:$0xff] }
 0x421   :  { %v2691_v0 = vpop.eup %2690 }
 0x422   :  { %v1177_v1 = vmul.f32 %v2691_v0, %v1176_v62  ;;  %v1682_v62 = vld [vmem:[%s4513_s5 + $0x208] sm:$0xff]  ;;  %v1684_v0 = vld [vmem:[%s4513_s5 + $0x218] sm:$0xff] }
 0x424   :  { %v3882_v5 = vadd.f32 %v1178_v3, %v1177_v1  ;;  %v1681_v1 = vld [vmem:[%s4513_s5 + $0x200] sm:$0xff]  ;;  %v1683_v3 = vld [vmem:[%s4513_s5 + $0x210] sm:$0xff] }
 0x426   :  { %1180 = vst [vmem:[%s4515_s7 + $0x18] sm:$0xff] %v3882_v5  ;;  %1297 = vmatmul.mubr.f32.vlgmr.msra.gmra.mxu0 %v3882_v5  ;;  %2610 = vmatmul.mubr.f32.vlgmr.msra.gmra.mxu1 %v3882_v5 }
 0x427   :  { %1448 = vmatpush1.msra.mxu0 %v3533_v21  ;;  %2613 = vmatpush3.msra.mxu1 %v3707_v43  ;;  %v1738_v21 = vld [vmem:[%s4513_s5 + $0x3c8] sm:$0xff] }
 0x428   :  { %1449 = vmatprep.subr.mxu0 %v3539_v24  ;;  %2614 = vmatprep.subr.mxu1 %v4559_v38  ;;  %v1740_v24 = vld [vmem:[%s4513_s5 + $0x3d8] sm:$0xff] }
 0x429   :  { %1450 = vmatpush1.msra.mxu0 %v3545_v27  ;;  %2615 = vmatpush3.msra.mxu1 %v3714_v11 }
 0x42a   :  { %1451 = vmatprep.subr.mxu0 %v3551_v28  ;;  %2616 = vmatprep.subr.mxu1 %v4559_v38 }
 0x42b   :  { %1452 = vmatpush1.msra.mxu0 %v3557_v29  ;;  %2617 = vmatpush3.msra.mxu1 %v3721_v13  ;;  %v4580_v29 = vld [vmem:[#allocation19_spill] sm:$0xff] }
 0x42c   :  { %1453 = vmatprep.subr.mxu0 %v3563_v30  ;;  %2618 = vmatprep.subr.mxu1 %v4559_v38 }
 0x42d   :  { %1454 = vmatpush1.msra.mxu0 %v3569_v31  ;;  %2619 = vmatpush3.msra.mxu1 %v3728_v6 }
 0x42e   :  { %1455 = vmatprep.subr.mxu0 %v3575_v32  ;;  %2620 = vmatprep.subr.mxu1 %v4559_v38 }
 0x42f   :  { %1456 = vmatpush1.msra.mxu0 %v3581_v33  ;;  %2621 = vmatpush3.msra.mxu1 %v3735_v9 }
 0x430   :  { %1457 = vmatprep.subr.mxu0 %v3587_v34  ;;  %2622 = vmatprep.subr.mxu1 %v4559_v38  ;;  %v4581_v34 = vld [vmem:[#allocation20_spill] sm:$0xff] }
 0x431   :  { %1458 = vmatpush1.msra.mxu0 %v3593_v35  ;;  %2623 = vmatpush3.msra.mxu1 %v3742_v25 }
 0x432   :  { %1459 = vmatprep.subr.mxu0 %v3599_v36  ;;  %2624 = vmatprep.subr.mxu1 %v4559_v38 }
 0x433   :  { %1460 = vmatpush1.msra.mxu0 %v3605_v37  ;;  %2625 = vmatpush3.msra.mxu1 %v3749_v23  ;;  %v1737_v23 = vld [vmem:[%s4513_s5 + $0x3c0] sm:$0xff] }
 0x434   :  { %1461 = vmatprep.subr.mxu0 %v3611_v26  ;;  %2626 = vmatprep.subr.mxu1 %v4559_v38 }
 0x435   :  { %1462 = vmatpush1.msra.mxu0 %v3617_v40  ;;  %2627 = vmatpush3.msra.mxu1 %v3756_v41  ;;  %v1730_v41 = vld [vmem:[%s4513_s5 + $0x388] sm:$0xff] }
 0x436   :  { %1463 = vmatprep.subr.mxu0 %v3622_v39  ;;  %2628 = vmatprep.subr.mxu1 %v4559_v38 }
 0x437   :  { %1464 = vmatpush1.msra.mxu0 %v3627_v44  ;;  %2629 = vmatpush3.msra.mxu1 %v3761_v48  ;;  %v1732_v48 = vld [vmem:[%s4513_s5 + $0x398] sm:$0xff] }
 0x438   :  { %1465 = vmatprep.subr.mxu0 %v3633_v42  ;;  %2630 = vmatprep.subr.mxu1 %v4559_v38 }
 0x439   :  { %1466 = vmatpush1.msra.mxu0 %v3639_v51  ;;  %2631 = vmatpush3.msra.mxu1 %v3778_v2  ;;  %v1722_v2 = vld [vmem:[%s4513_s5 + $0x348] sm:$0xff] }
 0x43a   :  { %1467 = vmatprep.subr.mxu0 %v3645_v54  ;;  %2632 = vmatprep.subr.mxu1 %v4559_v38  ;;  %v4582_v54 = vld [vmem:[#allocation24_spill] sm:$0xff] }
 0x43b   :  { %1468 = vmatpush1.msra.mxu0 %v3651_v49  ;;  %2633 = vmatpush3.msra.mxu1 %v3802_v16  ;;  %v1714_v16 = vld [vmem:[%s4513_s5 + $0x308] sm:$0xff] }
 0x43c   :  { %1469 = vmatprep.subr.mxu0 %v3767_v57  ;;  %2634 = vmatprep.subr.mxu1 %v4559_v38  ;;  %v1729_v57 = vld [vmem:[%s4513_s5 + $0x380] sm:$0xff] }
 0x43d   :  { %1470 = vmatpush1.msra.mxu0 %v3772_v63  ;;  %2635 = vmatpush3.msra.mxu1 %v3821_v56  ;;  %v1731_v63 = vld [vmem:[%s4513_s5 + $0x390] sm:$0xff] }
 0x43e   :  { %1471 = vmatprep.subr.mxu0 %v3784_v14  ;;  %2636 = vmatprep.subr.mxu1 %v4559_v38  ;;  %v1724_v14 = vld [vmem:[%s4513_s5 + $0x358] sm:$0xff]  ;;  %v1715_v56 = vld [vmem:[%s4513_s5 + $0x310] sm:$0xff] }
 0x43f   :  { %1472 = vmatpush1.msra.mxu0 %v3789_v15  ;;  %2637 = vmatpush3.msra.mxu1 %v3840_v58  ;;  %v1721_v15 = vld [vmem:[%s4513_s5 + $0x340] sm:$0xff] }
 0x440   :  { %1473 = vmatprep.subr.mxu0 %v3796_v53  ;;  %2638 = vmatprep.subr.mxu1 %v4559_v38  ;;  %v1723_v53 = vld [vmem:[%s4513_s5 + $0x350] sm:$0xff]  ;;  %v1705_v58 = vld [vmem:[%s4513_s5 + $0x2c0] sm:$0xff] }
 0x441   :  { %1474 = vmatpush1.msra.mxu0 %v3808_v55  ;;  %2639 = vmatpush3.msra.mxu1 %v3854_v47  ;;  %v1716_v55 = vld [vmem:[%s4513_s5 + $0x318] sm:$0xff]  ;;  %v1698_v47 = vld [vmem:[%s4513_s5 + $0x288] sm:$0xff] }
 0x442   :  { %1475 = vmatprep.subr.mxu0 %v3815_v17  ;;  %2640 = vmatprep.subr.mxu1 %v4559_v38  ;;  %v1713_v17 = vld [vmem:[%s4513_s5 + $0x300] sm:$0xff] }
 0x443   :  { %1476 = vmatpush1.msra.mxu0 %v3827_v19  ;;  %2641 = vmatpush3.msra.mxu1 %v4576_v45  ;;  %v1706_v19 = vld [vmem:[%s4513_s5 + $0x2c8] sm:$0xff] }
 0x444   :  { %1477 = vmatprep.subr.mxu0 %v4577_v12  ;;  %2642 = vmatprep.subr.mxu1 %v4559_v38  ;;  %v1674_v45 = vld [vmem:[%s4513_s5 + $0x1c8] sm:$0xff]  ;;  %v1676_v12 = vld [vmem:[%s4513_s5 + $0x1d8] sm:$0xff] }
 0x445   :  { %1478 = vmatpush1.msra.mxu0 %v4578_v4  ;;  %2643 = vmatpush3.msra.mxu1 %v4579_v60  ;;  %v1673_v4 = vld [vmem:[%s4513_s5 + $0x1c0] sm:$0xff]  ;;  %v1675_v60 = vld [vmem:[%s4513_s5 + $0x1d0] sm:$0xff] }
 0x446   :  { %1511 = vmatprep.mubr.f32.mxu0 %v4559_v38  ;;  %2644 = vmatprep.mubr.msk.f32.mxu1 %vm2737_vm0, %v4559_v38 }
 0x447   :  { %1787 = vmatprep.subr.mxu0 %v1738_v21  ;;  %1888 = vmatprep.subr.mxu1 %v1740_v24  ;;  %v1666_v21 = vld [vmem:[%s4513_s5 + $0x188] sm:$0xff]  ;;  %v1668_v24 = vld [vmem:[%s4513_s5 + $0x198] sm:$0xff] }
 0x4e6   :  { %v1298_v27 = vpop.f32.mrf.mxu0  ;;  %v1369_v28 = vpop.f32.mrf.mxu1 }
 0x4e7   :  { %v1373_v30 = vadd.f32 %v1298_v27, %v4580_v29  ;;  %v1387_v44 = vadd.f32 %v3399_v22, %v1369_v28  ;;  %v1739_v22 = vld [vmem:[%s4513_s5 + $0x3d0] sm:$0xff]  ;;  %v1665_v27 = vld [vmem:[%s4513_s5 + $0x180] sm:$0xff]  ;;  %v1658_v29 = vld [vmem:[%s4513_s5 + $0x148] sm:$0xff] }
 0x4e8   :  { %v2611_v31 = vpop.f32.mrf.mxu1  ;;  %v1300_v33 = vpop.f32.mrf.mxu0  ;;  %v1667_v28 = vld [vmem:[%s4513_s5 + $0x190] sm:$0xff] }
 0x4e9   :  { %v2268_v32 = vmul.f32 -1.442695, %v1373_v30  ;;  %v1380_v35 = vadd.f32 %v1300_v33, %v4581_v34  ;;  %v1660_v30 = vld [vmem:[%s4513_s5 + $0x158] sm:$0xff]  ;;  %v1657_v31 = vld [vmem:[%s4513_s5 + $0x140] sm:$0xff]  ;;  %v1650_v33 = vld [vmem:[%s4513_s5 + $0x108] sm:$0xff] }
 0x4ea   :  { %v1652_v34 = vld [vmem:[%s4513_s5 + $0x118] sm:$0xff] }
 0x4eb   :  { %2692 = vpow2.f32 %v2268_v32  ;;  %v2269_v36 = vmul.f32 -1.442695, %v1380_v35  ;;  %v1659_v32 = vld [vmem:[%s4513_s5 + $0x150] sm:$0xff]  ;;  %v1649_v35 = vld [vmem:[%s4513_s5 + $0x100] sm:$0xff] }
 0x4ed   :  { %2694 = vpow2.f32 %v2269_v36  ;;  %v1651_v36 = vld [vmem:[%s4513_s5 + $0x110] sm:$0xff] }
 0x4f8   :  { %v2693_v37 = vpop.eup %2692 }
 0x4f9   :  { %v1377_v26 = vadd.f32 1.0, %v2693_v37  ;;  %v1642_v37 = vld [vmem:[%s4513_s5 + $0xc8] sm:$0xff] }
 0x4fa   :  { %v2695_v40 = vpop.eup %2694 }
 0x4fb   :  { %2696 = vrcp.f32 %v1377_v26  ;;  %v1384_v39 = vadd.f32 1.0, %v2695_v40  ;;  %v1644_v26 = vld [vmem:[%s4513_s5 + $0xd8] sm:$0xff]  ;;  %v1641_v40 = vld [vmem:[%s4513_s5 + $0xc0] sm:$0xff] }
 0x4fd   :  { %2698 = vrcp.f32 %v1384_v39  ;;  %v1643_v39 = vld [vmem:[%s4513_s5 + $0xd0] sm:$0xff] }
 0x508   :  { %v2697_v42 = vpop.eup %2696 }
 0x509   :  { %v1388_v51 = vmul.f32 %v2697_v42, %v1387_v44  ;;  %v1634_v44 = vld [vmem:[%s4513_s5 + $0x88] sm:$0xff]  ;;  %v1636_v42 = vld [vmem:[%s4513_s5 + $0x98] sm:$0xff] }
 0x50a   :  { %v2699_v43 = vpop.eup %2698 }
 0x50b   :  { %v1389_v49 = vadd.f32 %v1388_v51, %v4582_v54  ;;  %v1391_v11 = vsub.f32 1.0, %v2699_v43  ;;  %v1393_v9 = vmul.f32 %v2699_v43, %v3882_v5  ;;  %v1633_v51 = vld [vmem:[%s4513_s5 + $0x80] sm:$0xff]  ;;  %v1635_v54 = vld [vmem:[%s4513_s5 + $0x90] sm:$0xff]  ;;  %v1628_v43 = vld [vmem:[%s4513_s5 + $0x58] sm:$0xff] }
 0x50d   :  { %2700 = vtanh.f32 %v1389_v49  ;;  %v1626_v49 = vld [vmem:[%s4513_s5 + $0x48] sm:$0xff] }
 0x51a   :  { %v2701_v13 = vpop.eup %2700 }
 0x51b   :  { %v1392_v6 = vmul.f32 %v2701_v13, %v1391_v11  ;;  %v1625_v11 = vld [vmem:[%s4513_s5 + $0x40] sm:$0xff]  ;;  %v1627_v13 = vld [vmem:[%s4513_s5 + $0x50] sm:$0xff] }
 0x51d   :  { %v3966_v25 = vadd.f32 %v1393_v9, %v1392_v6  ;;  %v1618_v6 = vld [vmem:[%s4513_s5 + $0x8] sm:$0xff]  ;;  %v1620_v9 = vld [vmem:[%s4513_s5 + $0x18] sm:$0xff] }
 0x51f   :  { %1395 = vst [vmem:[%s4515_s7 + $0x20] sm:$0xff] %v3966_v25  ;;  %1512 = vmatmul.mubr.f32.vlgmr.msra.gmra.mxu0 %v3966_v25  ;;  %2645 = vmatmul.mubr.f32.vlgmr.msra.gmra.mxu1 %v3966_v25 }
 0x520   :  { %1788 = vmatpush1.msra.mxu0 %v1737_v23  ;;  %1889 = vmatpush1.msra.mxu1 %v1739_v22  ;;  %v1617_v23 = vld [vmem:[%s4513_s5] sm:$0xff]  ;;  %v1619_v22 = vld [vmem:[%s4513_s5 + $0x10] sm:$0xff] }
 0x521   :  { %1789 = vmatprep.subr.mxu0 %v1730_v41  ;;  %1890 = vmatprep.subr.mxu1 %v1732_v48  ;;  %v4165_v41 = vld [vmem:[%s4515_s7] sm:$0xff]  ;;  %v4174_v48 = vld [vmem:[%s4515_s7 + $0x8] sm:$0xff] }
 0x522   :  { %1790 = vmatpush1.msra.mxu0 %v1729_v57  ;;  %1891 = vmatpush1.msra.mxu1 %v1731_v63  ;;  %v1744_v57 = vld [vmem:[%s4513_s5 + $0x3f8] sm:$0xff]  ;;  %v1741_v63 = vld [vmem:[%s4513_s5 + $0x3e0] sm:$0xff] }
 0x523   :  { %1791 = vmatprep.subr.mxu0 %v1722_v2  ;;  %1892 = vmatprep.subr.mxu1 %v1724_v14  ;;  %v1743_v2 = vld [vmem:[%s4513_s5 + $0x3f0] sm:$0xff]  ;;  %v1734_v14 = vld [vmem:[%s4513_s5 + $0x3a8] sm:$0xff] }
 0x524   :  { %1792 = vmatpush1.msra.mxu0 %v1721_v15  ;;  %1893 = vmatpush1.msra.mxu1 %v1723_v53  ;;  %v1736_v15 = vld [vmem:[%s4513_s5 + $0x3b8] sm:$0xff]  ;;  %v1733_v53 = vld [vmem:[%s4513_s5 + $0x3a0] sm:$0xff] }
 0x525   :  { %1793 = vmatprep.subr.mxu0 %v1714_v16  ;;  %1894 = vmatprep.subr.mxu1 %v1716_v55  ;;  %v1735_v16 = vld [vmem:[%s4513_s5 + $0x3b0] sm:$0xff]  ;;  %v1726_v55 = vld [vmem:[%s4513_s5 + $0x368] sm:$0xff] }
 0x526   :  { %1794 = vmatpush1.msra.mxu0 %v1713_v17  ;;  %1895 = vmatpush1.msra.mxu1 %v1715_v56  ;;  %v1728_v17 = vld [vmem:[%s4513_s5 + $0x378] sm:$0xff]  ;;  %v1725_v56 = vld [vmem:[%s4513_s5 + $0x360] sm:$0xff] }
 0x527   :  { %1795 = vmatprep.subr.mxu0 %v1706_v19  ;;  %1896 = vmatprep.subr.mxu1 %v1708_v20  ;;  %v1727_v19 = vld [vmem:[%s4513_s5 + $0x370] sm:$0xff]  ;;  %v1718_v20 = vld [vmem:[%s4513_s5 + $0x328] sm:$0xff] }
 0x528   :  { %1796 = vmatpush1.msra.mxu0 %v1705_v58  ;;  %1897 = vmatpush1.msra.mxu1 %v1707_v46  ;;  %v1720_v58 = vld [vmem:[%s4513_s5 + $0x338] sm:$0xff]  ;;  %v1717_v46 = vld [vmem:[%s4513_s5 + $0x320] sm:$0xff] }
 0x529   :  { %1797 = vmatprep.subr.mxu0 %v1698_v47  ;;  %1898 = vmatprep.subr.mxu1 %v1700_v50  ;;  %v1719_v47 = vld [vmem:[%s4513_s5 + $0x330] sm:$0xff]  ;;  %v1710_v50 = vld [vmem:[%s4513_s5 + $0x2e8] sm:$0xff] }
 0x52a   :  { %1798 = vmatpush1.msra.mxu0 %v1697_v59  ;;  %1899 = vmatpush1.msra.mxu1 %v1699_v61  ;;  %v1712_v59 = vld [vmem:[%s4513_s5 + $0x2f8] sm:$0xff]  ;;  %v1709_v61 = vld [vmem:[%s4513_s5 + $0x2e0] sm:$0xff] }
 0x52b   :  { %1799 = vmatprep.subr.mxu0 %v1690_v7  ;;  %1900 = vmatprep.subr.mxu1 %v1692_v8  ;;  %v1711_v7 = vld [vmem:[%s4513_s5 + $0x2f0] sm:$0xff]  ;;  %v1702_v8 = vld [vmem:[%s4513_s5 + $0x2a8] sm:$0xff] }
 0x52c   :  { %1800 = vmatpush1.msra.mxu0 %v1689_v52  ;;  %1901 = vmatpush1.msra.mxu1 %v1691_v18  ;;  %v1704_v52 = vld [vmem:[%s4513_s5 + $0x2b8] sm:$0xff]  ;;  %v1701_v18 = vld [vmem:[%s4513_s5 + $0x2a0] sm:$0xff] }
 0x52d   :  { %1801 = vmatprep.subr.mxu0 %v1682_v62  ;;  %1902 = vmatprep.subr.mxu1 %v1684_v0  ;;  %v1703_v62 = vld [vmem:[%s4513_s5 + $0x2b0] sm:$0xff]  ;;  %v1694_v0 = vld [vmem:[%s4513_s5 + $0x268] sm:$0xff] }
 0x52e   :  { %1802 = vmatpush1.msra.mxu0 %v1681_v1  ;;  %1903 = vmatpush1.msra.mxu1 %v1683_v3  ;;  %v1696_v1 = vld [vmem:[%s4513_s5 + $0x278] sm:$0xff]  ;;  %v1693_v3 = vld [vmem:[%s4513_s5 + $0x260] sm:$0xff] }
 0x52f   :  { %1803 = vmatprep.subr.mxu0 %v1674_v45  ;;  %1904 = vmatprep.subr.mxu1 %v1676_v12  ;;  %v1695_v45 = vld [vmem:[%s4513_s5 + $0x270] sm:$0xff]  ;;  %v1686_v12 = vld [vmem:[%s4513_s5 + $0x228] sm:$0xff] }
 0x530   :  { %1804 = vmatpush1.msra.mxu0 %v1673_v4  ;;  %1905 = vmatpush1.msra.mxu1 %v1675_v60  ;;  %v1688_v4 = vld [vmem:[%s4513_s5 + $0x238] sm:$0xff]  ;;  %v1685_v60 = vld [vmem:[%s4513_s5 + $0x220] sm:$0xff] }
 0x531   :  { %1805 = vmatprep.subr.mxu0 %v1666_v21  ;;  %1906 = vmatprep.subr.mxu1 %v1668_v24  ;;  %v1687_v21 = vld [vmem:[%s4513_s5 + $0x230] sm:$0xff]  ;;  %v1678_v24 = vld [vmem:[%s4513_s5 + $0x1e8] sm:$0xff] }
 0x532   :  { %1806 = vmatpush1.msra.mxu0 %v1665_v27  ;;  %1907 = vmatpush1.msra.mxu1 %v1667_v28  ;;  %v1680_v27 = vld [vmem:[%s4513_s5 + $0x1f8] sm:$0xff]  ;;  %v1677_v28 = vld [vmem:[%s4513_s5 + $0x1e0] sm:$0xff] }
 0x533   :  { %1807 = vmatprep.subr.mxu0 %v1658_v29  ;;  %1908 = vmatprep.subr.mxu1 %v1660_v30  ;;  %v1679_v29 = vld [vmem:[%s4513_s5 + $0x1f0] sm:$0xff]  ;;  %v1670_v30 = vld [vmem:[%s4513_s5 + $0x1a8] sm:$0xff] }
 0x534   :  { %1808 = vmatpush1.msra.mxu0 %v1657_v31  ;;  %1909 = vmatpush1.msra.mxu1 %v1659_v32  ;;  %v1672_v31 = vld [vmem:[%s4513_s5 + $0x1b8] sm:$0xff]  ;;  %v1669_v32 = vld [vmem:[%s4513_s5 + $0x1a0] sm:$0xff] }
 0x535   :  { %1809 = vmatprep.subr.mxu0 %v1650_v33  ;;  %1910 = vmatprep.subr.mxu1 %v1652_v34  ;;  %v1671_v33 = vld [vmem:[%s4513_s5 + $0x1b0] sm:$0xff]  ;;  %v1662_v34 = vld [vmem:[%s4513_s5 + $0x168] sm:$0xff] }
 0x536   :  { %1810 = vmatpush1.msra.mxu0 %v1649_v35  ;;  %1911 = vmatpush1.msra.mxu1 %v1651_v36  ;;  %v1664_v35 = vld [vmem:[%s4513_s5 + $0x178] sm:$0xff]  ;;  %v1661_v36 = vld [vmem:[%s4513_s5 + $0x160] sm:$0xff] }
 0x537   :  { %1811 = vmatprep.subr.mxu0 %v1642_v37  ;;  %1912 = vmatprep.subr.mxu1 %v1644_v26  ;;  %v1663_v37 = vld [vmem:[%s4513_s5 + $0x170] sm:$0xff]  ;;  %v1654_v26 = vld [vmem:[%s4513_s5 + $0x128] sm:$0xff] }
 0x538   :  { %1812 = vmatpush1.msra.mxu0 %v1641_v40  ;;  %1913 = vmatpush1.msra.mxu1 %v1643_v39  ;;  %v1656_v40 = vld [vmem:[%s4513_s5 + $0x138] sm:$0xff]  ;;  %v1653_v39 = vld [vmem:[%s4513_s5 + $0x120] sm:$0xff] }
 0x539   :  { %1813 = vmatprep.subr.mxu0 %v1634_v44  ;;  %1914 = vmatprep.subr.mxu1 %v1636_v42  ;;  %v1655_v44 = vld [vmem:[%s4513_s5 + $0x130] sm:$0xff]  ;;  %v1646_v42 = vld [vmem:[%s4513_s5 + $0xe8] sm:$0xff] }
 0x53a   :  { %1814 = vmatpush1.msra.mxu0 %v1633_v51  ;;  %1915 = vmatpush1.msra.mxu1 %v1635_v54  ;;  %v1648_v51 = vld [vmem:[%s4513_s5 + $0xf8] sm:$0xff]  ;;  %v1645_v54 = vld [vmem:[%s4513_s5 + $0xe0] sm:$0xff] }
 0x53b   :  { %1815 = vmatprep.subr.mxu0 %v1626_v49  ;;  %1916 = vmatprep.subr.mxu1 %v1628_v43  ;;  %v1647_v49 = vld [vmem:[%s4513_s5 + $0xf0] sm:$0xff]  ;;  %v1638_v43 = vld [vmem:[%s4513_s5 + $0xa8] sm:$0xff] }
 0x53c   :  { %1816 = vmatpush1.msra.mxu0 %v1625_v11  ;;  %1917 = vmatpush1.msra.mxu1 %v1627_v13  ;;  %v1640_v11 = vld [vmem:[%s4513_s5 + $0xb8] sm:$0xff]  ;;  %v1637_v13 = vld [vmem:[%s4513_s5 + $0xa0] sm:$0xff] }
 0x53d   :  { %1817 = vmatprep.subr.mxu0 %v1618_v6  ;;  %1918 = vmatprep.subr.mxu1 %v1620_v9  ;;  %v1639_v6 = vld [vmem:[%s4513_s5 + $0xb0] sm:$0xff]  ;;  %v1630_v9 = vld [vmem:[%s4513_s5 + $0x68] sm:$0xff] }
 0x53e   :  { %1818 = vmatpush1.msra.mxu0 %v1617_v23  ;;  %1851 = vmatprep.mubr.f32.mxu0 %v4559_v38  ;;  %v1632_v23 = vld [vmem:[%s4513_s5 + $0x78] sm:$0xff] }
 0x53f   :  { %1919 = vmatpush1.msra.mxu1 %v1619_v22  ;;  %1952 = vmatprep.mubr.f32.mxu1 %v4559_v38  ;;  %v1629_v22 = vld [vmem:[%s4513_s5 + $0x60] sm:$0xff] }
 0x540   :  { %1852 = vmatmul.mubr.f32.vlgmr.msra.gmra.mxu0 %v4165_v41  ;;  %1953 = vmatmul.mubr.f32.vlgmr.msra.gmra.mxu1 %v4165_v41 }
 0x541   :  { %1857 = vmatprep.mubr.f32.mxu0 %v4559_v38  ;;  %1958 = vmatprep.mubr.f32.mxu1 %v4559_v38 }
 0x542   :  { %2090 = vmatprep.subr.mxu1 %v1744_v57  ;;  %v1622_v57 = vld [vmem:[%s4513_s5 + $0x28] sm:$0xff] }
 0x543   :  { %2091 = vmatpush1.msra.mxu1 %v1743_v2  ;;  %v1621_v2 = vld [vmem:[%s4513_s5 + $0x20] sm:$0xff] }
 0x544   :  { %1858 = vmatmul.mubr.f32.gmra.mxu0 %v4174_v48  ;;  %1959 = vmatmul.mubr.f32.gmra.mxu1 %v4174_v48 }
 0x545   :  { %1863 = vmatprep.mubr.f32.mxu0 %v4559_v38  ;;  %1964 = vmatprep.mubr.f32.mxu1 %v4559_v38 }
 0x546   :  { %2092 = vmatprep.subr.mxu1 %v1736_v15 }
 0x547   :  { %2093 = vmatpush1.msra.mxu1 %v1735_v16  ;;  %v4583_v16 = vld [vmem:[#allocation21_spill] sm:$0xff] }
 0x548   :  { %1864 = vmatmul.mubr.f32.gmra.mxu0 %v3672_v10  ;;  %1965 = vmatmul.mubr.f32.gmra.mxu1 %v3672_v10  ;;  %v1742_v10 = vld [vmem:[%s4513_s5 + $0x3e8] sm:$0xff] }
 0x549   :  { %1869 = vmatprep.mubr.f32.mxu0 %v4559_v38  ;;  %1970 = vmatprep.mubr.f32.mxu1 %v4559_v38 }
 0x54a   :  { %1989 = vmatprep.subr.mxu0 %v1742_v10  ;;  %2094 = vmatprep.subr.mxu1 %v1728_v17  ;;  %v1631_v10 = vld [vmem:[%s4513_s5 + $0x70] sm:$0xff] }
 0x54b   :  { %1990 = vmatpush1.msra.mxu0 %v1741_v63  ;;  %2095 = vmatpush1.msra.mxu1 %v1727_v19  ;;  %v1624_v63 = vld [vmem:[%s4513_s5 + $0x38] sm:$0xff] }
 0x54c   :  { %1870 = vmatmul.mubr.f32.gmra.mxu0 %v3882_v5  ;;  %1971 = vmatmul.mubr.f32.gmra.mxu1 %v3882_v5 }
 0x54d   :  { %1875 = vmatprep.mubr.f32.mxu0 %v4559_v38  ;;  %1976 = vmatprep.mubr.f32.mxu1 %v4559_v38 }
 0x54e   :  { %1991 = vmatprep.subr.mxu0 %v1734_v14  ;;  %2096 = vmatprep.subr.mxu1 %v1720_v58  ;;  %v1623_v14 = vld [vmem:[%s4513_s5 + $0x30] sm:$0xff] }
 0x54f   :  { %1992 = vmatpush1.msra.mxu0 %v1733_v53  ;;  %2097 = vmatpush1.msra.mxu1 %v1719_v47 }
 0x550   :  { %1876 = vmatmul.mubr.f32.gmra.mxu0 %v3966_v25  ;;  %1977 = vmatmul.mubr.f32.gmra.mxu1 %v3966_v25 }
 0x551   :  { %1881 = vmatprep.mubr.f32.mxu0 %v4559_v38  ;;  %1982 = vmatprep.mubr.f32.mxu1 %v4559_v38 }
 0x552   :  { %1993 = vmatprep.subr.mxu0 %v1726_v55  ;;  %2098 = vmatprep.subr.mxu1 %v1712_v59  ;;  %v4389_v59 = vld [vmem:[%s4514_s6] sm:$0xff] }
 0x553   :  { %1994 = vmatpush1.msra.mxu0 %v1725_v56  ;;  %2099 = vmatpush1.msra.mxu1 %v1711_v7  ;;  %v4585_v7 = vld [vmem:[#allocation12_spill] sm:$0xff] }
 0x554   :  { %1995 = vmatprep.subr.mxu0 %v1718_v20  ;;  %2100 = vmatprep.subr.mxu1 %v1704_v52  ;;  %v4584_v20 = vld [vmem:[#allocation22_spill] sm:$0xff]  ;;  %v4586_v52 = vsub.s32 0, %v4585_v7 }
 0x555   :  { %1996 = vmatpush1.msra.mxu0 %v1717_v46  ;;  %2101 = vmatpush1.msra.mxu1 %v1703_v62  ;;  %v4587_v62 = vsub.s32 2, %v4585_v7 }
 0x556   :  { %1997 = vmatprep.subr.mxu0 %v1710_v50  ;;  %2102 = vmatprep.subr.mxu1 %v1696_v1 }
 0x557   :  { %1998 = vmatpush1.msra.mxu0 %v1709_v61  ;;  %2103 = vmatpush1.msra.mxu1 %v1695_v45 }
 0x558   :  { %1999 = vmatprep.subr.mxu0 %v1702_v8  ;;  %2104 = vmatprep.subr.mxu1 %v1688_v4  ;;  %v1761_v8 = vsub.s32 3, %v4585_v7  ;;  %v2712_v4 = vld [vmem:[%s4512_s4] ss:$0 sm:$0xff] }
 0x559   :  { %2000 = vmatpush1.msra.mxu0 %v1701_v18  ;;  %2105 = vmatpush1.msra.mxu1 %v1687_v21  ;;  %v4395_v18 = vrot.slane %v4389_v59, %v4586_v52 }
 0x55a   :  { %2001 = vmatprep.subr.mxu0 %v1694_v0  ;;  %2106 = vmatprep.subr.mxu1 %v1680_v27  ;;  %v4400_v0 = vrot.slane %v4389_v59, %v4587_v62 }
 0x55b   :  { %2002 = vmatpush1.msra.mxu0 %v1693_v3  ;;  %2107 = vmatpush1.msra.mxu1 %v1679_v29  ;;  %v4588_v3 = vsub.s32 1, %v4585_v7 }
 0x55c   :  { %2003 = vmatprep.subr.mxu0 %v1686_v12  ;;  %2108 = vmatprep.subr.mxu1 %v1672_v31  ;;  %v4408_v12 = vrot.slane %v4389_v59, %v1761_v8 }
 0x55d   :  { %2004 = vmatpush1.msra.mxu0 %v1685_v60  ;;  %2109 = vmatpush1.msra.mxu1 %v1671_v33  ;;  %v4405_v45 = vrot.slane %v4389_v59, %v4588_v3  ;;  %v2713_v3 = vld [vmem:[%s4515_s7 + $0x10] sm:$0xff] }
 0x55e   :  { %2005 = vmatprep.subr.mxu0 %v1678_v24  ;;  %2110 = vmatprep.subr.mxu1 %v1664_v35  ;;  %v4589_v35 = vld [vmem:[#allocation23_spill] sm:$0xff] }
 0x55f   :  { %2006 = vmatpush1.msra.mxu0 %v1677_v28  ;;  %2111 = vmatpush1.msra.mxu1 %v1663_v37 }
 0x560   :  { %2007 = vmatprep.subr.mxu0 %v1670_v30  ;;  %2112 = vmatprep.subr.mxu1 %v1656_v40 }
 0x561   :  { %2008 = vmatpush1.msra.mxu0 %v1669_v32  ;;  %2113 = vmatpush1.msra.mxu1 %v1655_v44 }
 0x562   :  { %2009 = vmatprep.subr.mxu0 %v1662_v34  ;;  %2114 = vmatprep.subr.mxu1 %v1648_v51 }
 0x563   :  { %2010 = vmatpush1.msra.mxu0 %v1661_v36  ;;  %2115 = vmatpush1.msra.mxu1 %v1647_v49 }
 0x564   :  { %2011 = vmatprep.subr.mxu0 %v1654_v26  ;;  %2116 = vmatprep.subr.mxu1 %v1640_v11 }
 0x565   :  { %2012 = vmatpush1.msra.mxu0 %v1653_v39  ;;  %2117 = vmatpush1.msra.mxu1 %v1639_v6 }
 0x566   :  { %2013 = vmatprep.subr.mxu0 %v1646_v42  ;;  %2118 = vmatprep.subr.mxu1 %v1632_v23 }
 0x567   :  { %2014 = vmatpush1.msra.mxu0 %v1645_v54  ;;  %2119 = vmatpush1.msra.mxu1 %v1631_v10 }
 0x568   :  { %2015 = vmatprep.subr.mxu0 %v1638_v43  ;;  %2120 = vmatprep.subr.mxu1 %v1624_v63 }
 0x569   :  { %2016 = vmatpush1.msra.mxu0 %v1637_v13  ;;  %2121 = vmatpush1.msra.mxu1 %v1623_v14 }
 0x56a   :  { %2017 = vmatprep.subr.mxu0 %v1630_v9 }
 0x56b   :  { %2018 = vmatpush1.msra.mxu0 %v1629_v22 }
 0x56c   :  { %2019 = vmatprep.subr.mxu0 %v1622_v57 }
 0x56d   :  { %2020 = vmatpush1.msra.mxu0 %v1621_v2 }
 0x5df   :  { %v1513_v15 = vpop.f32.mrf.mxu0  ;;  %v1584_v53 = vpop.f32.mrf.mxu1 }
 0x5e0   :  { %v1588_v55 = vadd.f32 %v1513_v15, %v4583_v16  ;;  %v1602_v60 = vadd.f32 %v2712_v4, %v1584_v53  ;;  %v1777_v4 = vsub.s32 7, %v4585_v7 }
 0x5e1   :  { %v2646_v17 = vpop.f32.mrf.mxu1  ;;  %v1515_v19 = vpop.f32.mrf.mxu0 }
 0x5e2   :  { %v2270_v56 = vmul.f32 -1.442695, %v1588_v55  ;;  %v1595_v58 = vadd.f32 %v1515_v19, %v4584_v20 }
 0x5e4   :  { %2702 = vpow2.f32 %v2270_v56  ;;  %v2271_v46 = vmul.f32 -1.442695, %v1595_v58 }
 0x5e6   :  { %2704 = vpow2.f32 %v2271_v46 }
 0x5f1   :  { %v2703_v47 = vpop.eup %2702 }
 0x5f2   :  { %v1592_v50 = vadd.f32 1.0, %v2703_v47 }
 0x5f3   :  { %v2705_v61 = vpop.eup %2704 }
 0x5f4   :  { %2706 = vrcp.f32 %v1592_v50  ;;  %v1599_v1 = vadd.f32 1.0, %v2705_v61 }
 0x5f6   :  { %2708 = vrcp.f32 %v1599_v1 }
 0x600   :  { %v1853_v21 = vpop.f32.mrf.mxu0  ;;  %v1954_v24 = vpop.f32.mrf.mxu1 }
 0x601   :  { %v2707_v27 = vpop.eup %2706  ;;  %v1854_v28 = vadd.f32 %v1853_v21, %v4395_v18  ;;  %v1955_v29 = vadd.f32 %v1954_v24, %v4400_v0 }
 0x602   :  { %v1603_v30 = vmul.f32 %v2707_v27, %v1602_v60  ;;  %v1855_v31 = vpop.f32.mrf.mxu0  ;;  %v1956_v32 = vpop.f32.mrf.mxu1 }
 0x603   :  { %2191 = vst [vmem:[#allocation3] sm:$0xff] %v1854_v28  ;;  %2193 = vst [vmem:[#allocation3 + $0x10] sm:$0xff] %v1955_v29  ;;  %v1856_v33 = vadd.f32 %v1855_v31, %v4405_v45  ;;  %v1957_v34 = vadd.f32 %v1956_v32, %v4408_v12  ;;  %v2709_v53 = vpop.eup %2708 }
 0x604   :  { %v1604_v36 = vadd.f32 %v1603_v30, %v4589_v35  ;;  %v1859_v37 = vpop.f32.mrf.mxu0  ;;  %v1960_v26 = vpop.f32.mrf.mxu1  ;;  %v1606_v58 = vsub.f32 1.0, %v2709_v53  ;;  %v1608_v62 = vmul.f32 %v2709_v53, %v3966_v25 }
 0x605   :  { %2192 = vst [vmem:[#allocation3 + $0x8] sm:$0xff] %v1856_v33  ;;  %2194 = vst [vmem:[#allocation3 + $0x18] sm:$0xff] %v1957_v34  ;;  %v1860_v40 = vadd.f32 %v1859_v37, %v4395_v18  ;;  %v1961_v39 = vadd.f32 %v1960_v26, %v4400_v0 }
 0x606   :  { %2710 = vtanh.f32 %v1604_v36  ;;  %v1861_v44 = vpop.f32.mrf.mxu0  ;;  %v1962_v42 = vpop.f32.mrf.mxu1 }
 0x607   :  { %2199 = vst [vmem:[#allocation3 + $0x40] sm:$0xff] %v1860_v40  ;;  %2201 = vst [vmem:[#allocation3 + $0x50] sm:$0xff] %v1961_v39  ;;  %v1862_v51 = vadd.f32 %v1861_v44, %v4405_v45  ;;  %v1963_v54 = vadd.f32 %v1962_v42, %v4408_v12 }
 0x608   :  { %v1865_v49 = vpop.f32.mrf.mxu0  ;;  %v1966_v43 = vpop.f32.mrf.mxu1 }
 0x609   :  { %2200 = vst [vmem:[#allocation3 + $0x48] sm:$0xff] %v1862_v51  ;;  %2202 = vst [vmem:[#allocation3 + $0x58] sm:$0xff] %v1963_v54  ;;  %v1866_v11 = vadd.f32 %v1865_v49, %v4395_v18  ;;  %v1967_v13 = vadd.f32 %v1966_v43, %v4400_v0 }
 0x60a   :  { %v1867_v6 = vpop.f32.mrf.mxu0  ;;  %v1968_v9 = vpop.f32.mrf.mxu1 }
 0x60b   :  { %2207 = vst [vmem:[#allocation3 + $0x80] sm:$0xff] %v1866_v11  ;;  %2209 = vst [vmem:[#allocation3 + $0x90] sm:$0xff] %v1967_v13  ;;  %v1868_v23 = vadd.f32 %v1867_v6, %v4405_v45  ;;  %v1969_v22 = vadd.f32 %v1968_v9, %v4408_v12 }
 0x60c   :  { %v1871_v10 = vpop.f32.mrf.mxu0  ;;  %v1972_v57 = vpop.f32.mrf.mxu1 }
 0x60d   :  { %2208 = vst [vmem:[#allocation3 + $0x88] sm:$0xff] %v1868_v23  ;;  %2210 = vst [vmem:[#allocation3 + $0x98] sm:$0xff] %v1969_v22  ;;  %v1872_v63 = vadd.f32 %v1871_v10, %v4395_v18  ;;  %v1973_v2 = vadd.f32 %v1972_v57, %v4400_v0 }
 0x60e   :  { %v1873_v14 = vpop.f32.mrf.mxu0  ;;  %v1974_v15 = vpop.f32.mrf.mxu1 }
 0x60f   :  { %2215 = vst [vmem:[#allocation3 + $0xc0] sm:$0xff] %v1872_v63  ;;  %2217 = vst [vmem:[#allocation3 + $0xd0] sm:$0xff] %v1973_v2  ;;  %v1874_v16 = vadd.f32 %v1873_v14, %v4405_v45  ;;  %v1975_v55 = vadd.f32 %v1974_v15, %v4408_v12 }
 0x610   :  { %v1877_v17 = vpop.f32.mrf.mxu0  ;;  %v1978_v56 = vpop.f32.mrf.mxu1 }
 0x611   :  { %2216 = vst [vmem:[#allocation3 + $0xc8] sm:$0xff] %v1874_v16  ;;  %2218 = vst [vmem:[#allocation3 + $0xd8] sm:$0xff] %v1975_v55  ;;  %v1878_v19 = vadd.f32 %v1877_v17, %v4395_v18  ;;  %v1979_v20 = vadd.f32 %v1978_v56, %v4400_v0 }
 0x612   :  { %v1879_v46 = vpop.f32.mrf.mxu0  ;;  %v1980_v47 = vpop.f32.mrf.mxu1 }
 0x613   :  { %v2711_v50 = vpop.eup %2710  ;;  %2223 = vst [vmem:[#allocation3 + $0x100] sm:$0xff] %v1878_v19  ;;  %2225 = vst [vmem:[#allocation3 + $0x110] sm:$0xff] %v1979_v20  ;;  %v1880_v61 = vadd.f32 %v1879_v46, %v4405_v45  ;;  %v1981_v8 = vadd.f32 %v1980_v47, %v4408_v12 }
 0x614   :  { %v1607_v52 = vmul.f32 %v2711_v50, %v1606_v58 }
 0x615   :  { %2224 = vst [vmem:[#allocation3 + $0x108] sm:$0xff] %v1880_v61  ;;  %2226 = vst [vmem:[#allocation3 + $0x118] sm:$0xff] %v1981_v8 }
 0x616   :  { %v1609_v1 = vadd.f32 %v1608_v62, %v1607_v52 }
 0x618   :  { %1610 = vst [vmem:[%s4515_s7 + $0x28] sm:$0xff] %v1609_v1  ;;  %1882 = vmatmul.mubr.f32.gmra.mxu0 %v1609_v1  ;;  %1983 = vmatmul.mubr.f32.gmra.mxu1 %v1609_v1  ;;  %s2738_s7 = smov [#allocation3]  }
 0x619   :  { %2053 = vmatprep.mubr.f32.mxu0 %v4559_v38  ;;  %2154 = vmatprep.mubr.f32.mxu1 %v4559_v38  ;;  %s2246_s18 = sshll.u32 %s2738_s7, 4  ;;  %s2247_s18 = int_to_ptr.vmem [resolvable:$true] %s2246_s18 }
 0x61a   :  { %s2714_s19 = scalar_lea.vmem %s2247_s18, 6144  ;;  %p2719_p1 = scmp.lt.s32.totalorder %s2247_s18, %s2247_s18 }
 0x61b   :  { %p2715_p0 = scmp.ne.s32.totalorder %s2247_s18, %s2714_s19  ;;  %p2720_p2 = scmp.lt.s32.totalorder %s2714_s19, %s2714_s19 }
 0x61c   :  { %2054 = vmatmul.mubr.f32.vlgmr.msra.gmra.mxu0 %v4165_v41  ;;  %2155 = vmatmul.mubr.f32.vlgmr.msra.gmra.mxu1 %v4165_v41  ;;  %v1765_v41 = vsub.s32 4, %v4585_v7 }
 0x61d   :  { %2059 = vmatprep.mubr.f32.mxu0 %v4559_v38  ;;  %2160 = vmatprep.mubr.f32.mxu1 %v4559_v38  ;;  %p2721_p3 = por %p2720_p2, %p2719_p1 }
 0x61e   :  { %v4468_v27 = vrot.slane %v4389_v59, %v1765_v41 }
 0x61f   :  { %p2722_p4 = pnand %p2721_p3, %p2715_p0 }
 0x620   :  { %2060 = vmatmul.mubr.f32.gmra.mxu0 %v4174_v48  ;;  %2161 = vmatmul.mubr.f32.gmra.mxu1 %v4174_v48  ;;  %v1773_v48 = vsub.s32 6, %v4585_v7 }
 0x621   :  { %2065 = vmatprep.mubr.f32.mxu0 %v4559_v38  ;;  %2166 = vmatprep.mubr.f32.mxu1 %v4559_v38 }
 0x624   :  { %2066 = vmatmul.mubr.f32.gmra.mxu0 %v2713_v3  ;;  %2167 = vmatmul.mubr.f32.gmra.mxu1 %v2713_v3 }
 0x625   :  { %2071 = vmatprep.mubr.f32.mxu0 %v4559_v38  ;;  %2172 = vmatprep.mubr.f32.mxu1 %v4559_v38 }
 0x628   :  { %2072 = vmatmul.mubr.f32.gmra.mxu0 %v3882_v5  ;;  %2173 = vmatmul.mubr.f32.gmra.mxu1 %v3882_v5  ;;  %v1769_v5 = vsub.s32 5, %v4585_v7 }
 0x629   :  { %2077 = vmatprep.mubr.f32.mxu0 %v4559_v38  ;;  %2178 = vmatprep.mubr.f32.mxu1 %v4559_v38 }
 0x62a   :  { %v4476_v31 = vrot.slane %v4389_v59, %v1769_v5 }
 0x62c   :  { %2078 = vmatmul.mubr.f32.gmra.mxu0 %v3966_v25  ;;  %2179 = vmatmul.mubr.f32.gmra.mxu1 %v3966_v25 }
 0x62d   :  { %2083 = vmatprep.mubr.f32.mxu0 %v4559_v38  ;;  %2184 = vmatprep.mubr.f32.mxu1 %v4559_v38  ;;  %v4471_v38 = vrot.slane %v4389_v59, %v1773_v48 }
 0x630   :  { %2084 = vmatmul.mubr.f32.gmra.mxu0 %v1609_v1  ;;  %2185 = vmatmul.mubr.f32.gmra.mxu1 %v1609_v1 }
 0x6d8   :  { %v1883_v60 = vpop.f32.mrf.mxu0  ;;  %v1984_v21 = vpop.f32.mrf.mxu1 }
 0x6d9   :  { %v1884_v24 = vadd.f32 %v1883_v60, %v4395_v18  ;;  %v1985_v25 = vadd.f32 %v1984_v21, %v4400_v0  ;;  %v4479_v18 = vrot.slane %v4389_v59, %v1777_v4 }
 0x6da   :  { %v1885_v28 = vpop.f32.mrf.mxu0  ;;  %v1986_v29 = vpop.f32.mrf.mxu1 }
 0x6db   :  { %2231 = vst [vmem:[#allocation3 + $0x140] sm:$0xff] %v1884_v24  ;;  %2233 = vst [vmem:[#allocation3 + $0x150] sm:$0xff] %v1985_v25  ;;  %v1886_v30 = vadd.f32 %v1885_v28, %v4405_v45  ;;  %v1987_v7 = vadd.f32 %v1986_v29, %v4408_v12 }
 0x6dc   :  { %v2055_v0 = vpop.f32.mrf.mxu0  ;;  %v2156_v32 = vpop.f32.mrf.mxu1 }
 0x6dd   :  { %2232 = vst [vmem:[#allocation3 + $0x148] sm:$0xff] %v1886_v30  ;;  %2234 = vst [vmem:[#allocation3 + $0x158] sm:$0xff] %v1987_v7  ;;  %v2056_v33 = vadd.f32 %v2055_v0, %v4468_v27  ;;  %v2157_v34 = vadd.f32 %v2156_v32, %v4471_v38 }
 0x6de   :  { %v2057_v35 = vpop.f32.mrf.mxu0  ;;  %v2158_v36 = vpop.f32.mrf.mxu1 }
 0x6df   :  { %2195 = vst [vmem:[#allocation3 + $0x20] sm:$0xff] %v2056_v33  ;;  %2197 = vst [vmem:[#allocation3 + $0x30] sm:$0xff] %v2157_v34  ;;  %v2058_v45 = vadd.f32 %v2057_v35, %v4476_v31  ;;  %v2159_v12 = vadd.f32 %v2158_v36, %v4479_v18 }
 0x6e0   :  { %v2061_v37 = vpop.f32.mrf.mxu0  ;;  %v2162_v26 = vpop.f32.mrf.mxu1 }
 0x6e1   :  { %2196 = vst [vmem:[#allocation3 + $0x28] sm:$0xff] %v2058_v45  ;;  %2198 = vst [vmem:[#allocation3 + $0x38] sm:$0xff] %v2159_v12  ;;  %v2062_v59 = vadd.f32 %v2061_v37, %v4468_v27  ;;  %v2163_v40 = vadd.f32 %v2162_v26, %v4471_v38 }
 0x6e2   :  { %v2063_v39 = vpop.f32.mrf.mxu0  ;;  %v2164_v44 = vpop.f32.mrf.mxu1 }
 0x6e3   :  { %2203 = vst [vmem:[#allocation3 + $0x60] sm:$0xff] %v2062_v59  ;;  %2205 = vst [vmem:[#allocation3 + $0x70] sm:$0xff] %v2163_v40  ;;  %v2064_v42 = vadd.f32 %v2063_v39, %v4476_v31  ;;  %v2165_v51 = vadd.f32 %v2164_v44, %v4479_v18 }
 0x6e4   :  { %v2067_v54 = vpop.f32.mrf.mxu0  ;;  %v2168_v49 = vpop.f32.mrf.mxu1 }
 0x6e5   :  { %2204 = vst [vmem:[#allocation3 + $0x68] sm:$0xff] %v2064_v42  ;;  %2206 = vst [vmem:[#allocation3 + $0x78] sm:$0xff] %v2165_v51  ;;  %v2068_v43 = vadd.f32 %v2067_v54, %v4468_v27  ;;  %v2169_v11 = vadd.f32 %v2168_v49, %v4471_v38 }
 0x6e6   :  { %v2069_v13 = vpop.f32.mrf.mxu0  ;;  %v2170_v6 = vpop.f32.mrf.mxu1 }
 0x6e7   :  { %2211 = vst [vmem:[#allocation3 + $0xa0] sm:$0xff] %v2068_v43  ;;  %2213 = vst [vmem:[#allocation3 + $0xb0] sm:$0xff] %v2169_v11  ;;  %v2070_v9 = vadd.f32 %v2069_v13, %v4476_v31  ;;  %v2171_v23 = vadd.f32 %v2170_v6, %v4479_v18 }
 0x6e8   :  { %v2073_v22 = vpop.f32.mrf.mxu0  ;;  %v2174_v10 = vpop.f32.mrf.mxu1 }
 0x6e9   :  { %2212 = vst [vmem:[#allocation3 + $0xa8] sm:$0xff] %v2070_v9  ;;  %2214 = vst [vmem:[#allocation3 + $0xb8] sm:$0xff] %v2171_v23  ;;  %v2074_v57 = vadd.f32 %v2073_v22, %v4468_v27  ;;  %v2175_v63 = vadd.f32 %v2174_v10, %v4471_v38 }
 0x6ea   :  { %v2075_v2 = vpop.f32.mrf.mxu0  ;;  %v2176_v14 = vpop.f32.mrf.mxu1 }
 0x6eb   :  { %2219 = vst [vmem:[#allocation3 + $0xe0] sm:$0xff] %v2074_v57  ;;  %2221 = vst [vmem:[#allocation3 + $0xf0] sm:$0xff] %v2175_v63  ;;  %v2076_v15 = vadd.f32 %v2075_v2, %v4476_v31  ;;  %v2177_v53 = vadd.f32 %v2176_v14, %v4479_v18 }
 0x6ec   :  { %v2079_v16 = vpop.f32.mrf.mxu0  ;;  %v2180_v55 = vpop.f32.mrf.mxu1 }
 0x6ed   :  { %2220 = vst [vmem:[#allocation3 + $0xe8] sm:$0xff] %v2076_v15  ;;  %2222 = vst [vmem:[#allocation3 + $0xf8] sm:$0xff] %v2177_v53  ;;  %v2080_v17 = vadd.f32 %v2079_v16, %v4468_v27  ;;  %v2181_v56 = vadd.f32 %v2180_v55, %v4471_v38 }
 0x6ee   :  { %v2081_v19 = vpop.f32.mrf.mxu0  ;;  %v2182_v20 = vpop.f32.mrf.mxu1 }
 0x6ef   :  { %2227 = vst [vmem:[#allocation3 + $0x120] sm:$0xff] %v2080_v17  ;;  %2229 = vst [vmem:[#allocation3 + $0x130] sm:$0xff] %v2181_v56  ;;  %v2082_v58 = vadd.f32 %v2081_v19, %v4476_v31  ;;  %v2183_v46 = vadd.f32 %v2182_v20, %v4479_v18 }
 0x6f0   :  { %v2085_v47 = vpop.f32.mrf.mxu0  ;;  %v2186_v50 = vpop.f32.mrf.mxu1 }
 0x6f1   :  { %2228 = vst [vmem:[#allocation3 + $0x128] sm:$0xff] %v2082_v58  ;;  %2230 = vst [vmem:[#allocation3 + $0x138] sm:$0xff] %v2183_v46  ;;  %v2086_v61 = vadd.f32 %v2085_v47, %v4468_v27  ;;  %v2187_v8 = vadd.f32 %v2186_v50, %v4471_v38 }
 0x6f2   :  { %v2087_v52 = vpop.f32.mrf.mxu0  ;;  %v2188_v62 = vpop.f32.mrf.mxu1 }
 0x6f3   :  { %2235 = vst [vmem:[#allocation3 + $0x160] sm:$0xff] %v2086_v61  ;;  %2237 = vst [vmem:[#allocation3 + $0x170] sm:$0xff] %v2187_v8  ;;  %v2088_v1 = vadd.f32 %v2087_v52, %v4476_v31  ;;  %v2189_v3 = vadd.f32 %v2188_v62, %v4479_v18 }
 0x6f5   :  { %2236 = vst [vmem:[#allocation3 + $0x168] sm:$0xff] %v2088_v1  ;;  %2238 = vst [vmem:[#allocation3 + $0x178] sm:$0xff] %v2189_v3 }
 0x6f6   :  { %2725 = shalt.err (!%p2722_p4)
}
 0x6f7   :  { %s2739_s20 = smov 1024   ;;  %s2740_s21 = smov 64  }
 0x6f8   :  { %2252 = dma.vmem_to_hbm [thread:$0]  %s2247_s18, 6144, %s4516_s8, [#allocation4], %s2739_s20, %s2739_s20, %s2740_s21  }
 0x6f9   :  { %2734 = dma.done.wait [#allocation4], 6144  }
 0x6fa   :  { %2735 = vsyncadd [#allocation4], 4294961152 }
 0x6fb   :  { %2258 = vsyncpa [#allocation4], 1 }

</bundles_post_ra>
